<compile_context>
chip_gen: v7x
topology: tpu7x:2x2x1
jax: 0.10.0
libtpu: 0.0.40
codegen_flags: <defaults>
</compile_context>

<pallas_src>
import functools

import jax
import jax.numpy as jnp
import numpy as np
from jax.experimental import pallas as pl
from jax.experimental.pallas import tpu as pltpu


# ----------------------------------------------------------------------------
# helpers
# ----------------------------------------------------------------------------
def _round_up(x, m):
    return ((x + m - 1) // m) * m


def _pad_axis(x, target, axis):
    pad = target - x.shape[axis]
    if pad <= 0:
        return x
    widths = [(0, 0)] * x.ndim
    widths[axis] = (0, pad)
    return jnp.pad(x, widths)


def _pad_gate_cols(w, h, hp):
    """(..., 4*h) with gate order [i|f|o|g] -> (..., 4*hp): each gate gets its
    own hp-wide, 128-lane-aligned column slab (zero padded)."""
    lead = w.shape[:-1]
    w = w.reshape(*lead, 4, h)
    w = _pad_axis(w, hp, w.ndim - 1)
    return w.reshape(*lead, 4 * hp)


# ----------------------------------------------------------------------------
# kernel
# ----------------------------------------------------------------------------
def _sclstm_kernel(*refs, num_layers, hp, alpha):
    # ref order (inputs):
    #   xg0 (1,BT,4Hp)  : x_t @ Wg_x0 + bg0               (streamed per t)
    #   xr  (1,BT,Sp)   : x_t @ W_ir + b_ir + alpha*b_hr  (streamed per t)
    #   h0, c0 (BT,L*Hp), s0 (BT,Sp)                      (per batch tile)
    #   whr (L*Hp,Sp), ws_all (Sp,L*Hp), bs_all (1,L*Hp)  (resident weights)
    #   per layer l:           wg_h_l (Hp,4Hp)
    #   per layer l>=1:        wg_x_l (Hp,4Hp), bg_l (1,4Hp)
    # outputs: out (1,BT,Hp), ht (BT,L*Hp), ct (BT,L*Hp), st (BT,Sp)
    # scratch: h_sc, c_sc (BT,L*Hp) f32, s_sc (BT,Sp) f32
    L = num_layers
    n_layer = L + 2 * (L - 1)
    (xg0_ref, xr_ref, h0_ref, c0_ref, s0_ref,
     whr_ref, ws_ref, bs_ref) = refs[:8]
    layer_refs = refs[8:8 + n_layer]
    out_ref, ht_ref, ct_ref, st_ref = refs[8 + n_layer:8 + n_layer + 4]
    h_sc, c_sc, s_sc = refs[8 + n_layer + 4:]

    wgh_refs = list(layer_refs[:L])
    extra = layer_refs[L:]
    wgx_refs = [None] + [extra[2 * i] for i in range(L - 1)]
    bg_refs = [None] + [extra[2 * i + 1] for i in range(L - 1)]

    t = pl.program_id(1)
    n_t = pl.num_programs(1)

    @pl.when(t == 0)
    def _init():
        h_sc[...] = h0_ref[...].astype(jnp.float32)
        c_sc[...] = c0_ref[...].astype(jnp.float32)
        s_sc[...] = s0_ref[...].astype(jnp.float32)

    h_prev = h_sc[...]                      # (BT, L*Hp)  h_{t-1}, all layers
    s_prev = s_sc[...]                      # (BT, Sp)

    # ---- SlotCell: r_t = sigmoid(x@W_ir + b_ir + alpha*(h_flat@W_hr + b_hr))
    #      (the x path and both biases are folded into xr in the wrapper)
    hr = jnp.dot(h_prev, whr_ref[...], preferred_element_type=jnp.float32)
    r_t = jax.nn.sigmoid(xr_ref[0].astype(jnp.float32) + alpha * hr)
    s_new = s_prev * r_t
    s_sc[...] = s_new

    # ---- slot_linear for all layers fused into one matmul -> (BT, L*Hp)
    slot_info = jnp.tanh(
        jnp.dot(s_new, ws_ref[...], preferred_element_type=jnp.float32)
        + bs_ref[...].astype(jnp.float32))

    # ---- stacked SCLSTM cells (skip_connections=False, dropout p=0)
    cur = None
    for l in range(L):
        lo, hi = l * hp, (l + 1) * hp
        h_l = h_prev[:, lo:hi]
        c_l = c_sc[:, lo:hi]
        rec = jnp.dot(h_l, wgh_refs[l][...], preferred_element_type=jnp.float32)
        if l == 0:
            gates = xg0_ref[0].astype(jnp.float32) + rec
        else:
            gates = (jnp.dot(cur, wgx_refs[l][...],
                             preferred_element_type=jnp.float32)
                     + rec + bg_refs[l][...].astype(jnp.float32))
        i_g = jax.nn.sigmoid(gates[:, 0 * hp:1 * hp])
        f_g = jax.nn.sigmoid(gates[:, 1 * hp:2 * hp])
        o_g = jax.nn.sigmoid(gates[:, 2 * hp:3 * hp])
        info = jnp.tanh(gates[:, 3 * hp:4 * hp])
        c_new = f_g * c_l + i_g * info + slot_info[:, lo:hi]
        h_new = o_g * jnp.tanh(c_new)
        c_sc[:, lo:hi] = c_new
        h_sc[:, lo:hi] = h_new
        cur = h_new

    out_ref[0] = cur.astype(out_ref.dtype)   # last layer hidden

    @pl.when(t == n_t - 1)
    def _finalize():
        ht_ref[...] = h_sc[...].astype(ht_ref.dtype)
        ct_ref[...] = c_sc[...].astype(ct_ref.dtype)
        st_ref[...] = s_sc[...].astype(st_ref.dtype)


# ----------------------------------------------------------------------------
# wrapper
# ----------------------------------------------------------------------------
def sclstm_forward(params, inputs, h0=None, c0=None, s0=None, alpha=0.5):
    """inputs: (B, T, I). Returns (outputs (B,T,H), (ht (B,L,H), ct (B,L,H)), st (B,S))."""
    B, T, I = inputs.shape
    L = params["num_layers"]
    H = params["hidden_size"]
    S = params["slot_size"]
    dtype = inputs.dtype

    Hp = _round_up(H, 128)
    Sp = _round_up(S, 128)
    BT = 8                                   # sublane-aligned batch tile
    Bp = _round_up(B, BT)
    NB = Bp // BT
    G = 4 * Hp
    LHp = L * Hp

    if h0 is None:
        h0 = jnp.zeros((B, L, H), dtype)
    if c0 is None:
        c0 = jnp.zeros((B, L, H), dtype)
    if s0 is None:
        s0 = jnp.zeros((B, S), dtype)

    # ---- padded / pre-split weights (each gate on its own 128-lane slab) ----
    wg0 = params["wg"][0]                                    # (I+H, 4H)
    wgx0_p = _pad_gate_cols(wg0[:I, :], H, Hp)               # (I, G)
    wgh0_p = _pad_axis(_pad_gate_cols(wg0[I:, :], H, Hp), Hp, 0)   # (Hp, G)
    bg0_p = _pad_gate_cols(params["bg"][0], H, Hp)           # (1, G)

    wgh_list = [wgh0_p]
    extra_list = []
    for l in range(1, L):
        wgl = params["wg"][l]                                # (2H, 4H)
        wgx_l = _pad_axis(_pad_gate_cols(wgl[:H, :], H, Hp), Hp, 0)
        wgh_l = _pad_axis(_pad_gate_cols(wgl[H:, :], H, Hp), Hp, 0)
        bg_l = _pad_gate_cols(params["bg"][l], H, Hp)
        wgh_list.append(wgh_l)
        extra_list += [wgx_l, bg_l]

    whr_p = _pad_axis(_pad_axis(params["whr"].reshape(L, H, S), Hp, 1), Sp, 2)
    whr_p = whr_p.reshape(LHp, Sp)                           # (L*Hp, Sp)
    ws_p = jnp.concatenate(
        [_pad_axis(_pad_axis(params["ws"][l], Sp, 0), Hp, 1) for l in range(L)],
        axis=1)                                              # (Sp, L*Hp)
    bs_p = jnp.concatenate(
        [_pad_axis(params["bs"][l], Hp, 1) for l in range(L)], axis=1)  # (1, L*Hp)
    wir_p = _pad_axis(params["wir"], Sp, 1)                  # (I, Sp)
    bir_p = _pad_axis(params["bir"], Sp, 1)
    bhr_p = _pad_axis(params["bhr"], Sp, 1)

    # ---- hoist all x-dependent projections out of the recurrence:
    #      one big (T*Bp, I) matmul for the layer-0 gates and SlotCell path.
    x_tm = _pad_axis(jnp.transpose(inputs, (1, 0, 2)), Bp, 1)      # (T, Bp, I)
    x2 = x_tm.reshape(T * Bp, I).astype(jnp.float32)
    dot = functools.partial(jnp.dot, precision=jax.lax.Precision.HIGHEST)
    xg0 = (dot(x2, wgx0_p) + bg0_p).reshape(T, Bp, G)              # f32
    xr = (dot(x2, wir_p) + bir_p + alpha * bhr_p).reshape(T, Bp, Sp)

    h0_p = _pad_axis(_pad_axis(h0, Hp, 2), Bp, 0).reshape(Bp, LHp)
    c0_p = _pad_axis(_pad_axis(c0, Hp, 2), Bp, 0).reshape(Bp, LHp)
    s0_p = _pad_axis(_pad_axis(s0, Sp, 1), Bp, 0)

    args = [xg0, xr, h0_p, c0_p, s0_p, whr_p, ws_p, bs_p] + wgh_list + extra_list

    stream = lambda last: pl.BlockSpec((1, BT, last), lambda b, t: (t, b, 0))
    per_b = lambda last: pl.BlockSpec((BT, last), lambda b, t: (b, 0))
    const2 = lambda r, c: pl.BlockSpec((r, c), lambda b, t: (0, 0))

    in_specs = [
        stream(G), stream(Sp),
        per_b(LHp), per_b(LHp), per_b(Sp),
        const2(LHp, Sp), const2(Sp, LHp), const2(1, LHp),
    ]
    in_specs += [const2(Hp, G) for _ in wgh_list]
    for _ in range(1, L):
        in_specs += [const2(Hp, G), const2(1, G)]

    out_specs = (
        pl.BlockSpec((1, BT, Hp), lambda b, t: (t, b, 0)),
        per_b(LHp), per_b(LHp), per_b(Sp),
    )
    out_shape = (
        jax.ShapeDtypeStruct((T, Bp, Hp), dtype),
        jax.ShapeDtypeStruct((Bp, LHp), dtype),
        jax.ShapeDtypeStruct((Bp, LHp), dtype),
        jax.ShapeDtypeStruct((Bp, Sp), dtype),
    )

    kernel = functools.partial(_sclstm_kernel, num_layers=L, hp=Hp, alpha=alpha)
    out_p, ht_p, ct_p, st_p = pl.pallas_call(
        kernel,
        grid=(NB, T),
        in_specs=in_specs,
        out_specs=out_specs,
        out_shape=out_shape,
        scratch_shapes=[
            pltpu.VMEM((BT, LHp), jnp.float32),   # h state
            pltpu.VMEM((BT, LHp), jnp.float32),   # c state
            pltpu.VMEM((BT, Sp), jnp.float32),    # s state
        ],
        compiler_params=pltpu.CompilerParams(
            dimension_semantics=("parallel", "arbitrary")),
    )(*args)

    outputs = jnp.transpose(out_p[:, :B, :H], (1, 0, 2))     # (B, T, H)
    ht = ht_p[:B].reshape(B, L, Hp)[:, :, :H]                 # (B, L, H)
    ct = ct_p[:B].reshape(B, L, Hp)[:, :, :H]
    st = st_p[:B, :S]                                         # (B, S)
    return outputs, (ht, ct), st


# ----------------------------------------------------------------------------
# synthetic params + plain-JAX reference (numerical check)
# ----------------------------------------------------------------------------
def make_params(key, input_size, hidden_size, slot_size, num_layers):
    """Deterministic synthetic parameters with nn.Linear-equivalent shapes (transposed)."""
    I, H, S, L = input_size, hidden_size, slot_size, num_layers
    keys = jax.random.split(key, 4 + 4 * L)
    scale = 0.1
    p = {
        "num_layers": L, "hidden_size": H, "slot_size": S, "input_size": I,
        # SlotCell
        "wir": scale * jax.random.normal(keys[0], (I, S), jnp.float32),
        "bir": scale * jax.random.normal(keys[1], (1, S), jnp.float32),
        "whr": scale * jax.random.normal(keys[2], (L * H, S), jnp.float32),
        "bhr": scale * jax.random.normal(keys[3], (1, S), jnp.float32),
        # per-layer SCLSTMCell
        "wg": [], "bg": [], "ws": [], "bs": [],
    }
    for l in range(L):
        in_l = I if l == 0 else H  # skip_connections=False
        k = keys[4 + 4 * l: 8 + 4 * l]
        p["wg"].append(scale * jax.random.normal(k[0], (in_l + H, 4 * H), jnp.float32))
        p["bg"].append(scale * jax.random.normal(k[1], (1, 4 * H), jnp.float32))
        p["ws"].append(scale * jax.random.normal(k[2], (S, H), jnp.float32))
        p["bs"].append(scale * jax.random.normal(k[3], (1, H), jnp.float32))
    return p


def sclstm_reference(params, inputs, alpha=0.5):
    """Plain-JAX mirror of the PyTorch forward for numerical checking."""
    B, T, _ = inputs.shape
    L, H, S = params["num_layers"], params["hidden_size"], params["slot_size"]
    dot = functools.partial(jnp.dot, precision=jax.lax.Precision.HIGHEST)
    h = jnp.zeros((B, L, H), inputs.dtype)
    c = jnp.zeros((B, L, H), inputs.dtype)
    s = jnp.zeros((B, S), inputs.dtype)
    outs = []
    for t in range(T):
        x_t = inputs[:, t, :]
        h_flat = h.reshape(B, L * H)
        r_t = jax.nn.sigmoid(dot(x_t, params["wir"]) + params["bir"]
                             + alpha * (dot(h_flat, params["whr"]) + params["bhr"]))
        s = s * r_t
        cur = x_t
        new_h, new_c = [], []
        for l in range(L):
            combined = jnp.concatenate([cur, h[:, l, :]], axis=1)
            gates = dot(combined, params["wg"][l]) + params["bg"][l]
            i_g = jax.nn.sigmoid(gates[:, :H])
            f_g = jax.nn.sigmoid(gates[:, H:2 * H])
            o_g = jax.nn.sigmoid(gates[:, 2 * H:3 * H])
            info = jnp.tanh(gates[:, 3 * H:])
            slot_info = jnp.tanh(dot(s, params["ws"][l]) + params["bs"][l])
            c_l = f_g * c[:, l, :] + i_g * info + slot_info
            h_l = o_g * jnp.tanh(c_l)
            new_h.append(h_l)
            new_c.append(c_l)
            cur = h_l
        h = jnp.stack(new_h, axis=1)
        c = jnp.stack(new_c, axis=1)
        outs.append(h[:, -1, :])
    return jnp.stack(outs, axis=1), (h, c), s


if __name__ == "__main__":
    B, T = 2, 8
    INPUT, HIDDEN, SLOT, LAYERS = 32, 32, 16, 2

    key = jax.random.PRNGKey(0)
    k_param, k_x = jax.random.split(key)
    params = make_params(k_param, INPUT, HIDDEN, SLOT, LAYERS)
    inputs = jax.random.normal(k_x, (B, T, INPUT), jnp.float32)

    outputs, (ht, ct), st = sclstm_forward(params, inputs, alpha=0.5)
    jax.block_until_ready((outputs, ht, ct, st))

    ref_out, (ref_h, ref_c), ref_s = sclstm_reference(params, inputs, alpha=0.5)
    np.testing.assert_allclose(np.asarray(outputs), np.asarray(ref_out), rtol=1e-2, atol=1e-2)
    np.testing.assert_allclose(np.asarray(ht), np.asarray(ref_h), rtol=1e-2, atol=1e-2)
    np.testing.assert_allclose(np.asarray(ct), np.asarray(ref_c), rtol=1e-2, atol=1e-2)
    np.testing.assert_allclose(np.asarray(st), np.asarray(ref_s), rtol=1e-2, atol=1e-2)

    assert outputs.shape == (B, T, HIDDEN)
    assert ht.shape == (B, LAYERS, HIDDEN) and ct.shape == (B, LAYERS, HIDDEN)
    assert st.shape == (B, SLOT)
    print("KERNEL_OK")
</pallas_src>

<mosaic_0001>
module attributes {stable_mosaic.version = 11 : i64} {
  func.func @_sclstm_kernel(%arg0: i32, %arg1: i32, %arg2: memref<1x8x512xf32, #tpu.memory_space<vmem>>, %arg3: memref<1x8x128xf32, #tpu.memory_space<vmem>>, %arg4: memref<8x256xf32, #tpu.memory_space<vmem>>, %arg5: memref<8x256xf32, #tpu.memory_space<vmem>>, %arg6: memref<8x128xf32, #tpu.memory_space<vmem>>, %arg7: memref<256x128xf32, #tpu.memory_space<vmem>>, %arg8: memref<128x256xf32, #tpu.memory_space<vmem>>, %arg9: memref<1x256xf32, #tpu.memory_space<vmem>>, %arg10: memref<128x512xf32, #tpu.memory_space<vmem>>, %arg11: memref<128x512xf32, #tpu.memory_space<vmem>>, %arg12: memref<128x512xf32, #tpu.memory_space<vmem>>, %arg13: memref<1x512xf32, #tpu.memory_space<vmem>>, %arg14: memref<1x8x128xf32, #tpu.memory_space<vmem>>, %arg15: memref<8x256xf32, #tpu.memory_space<vmem>>, %arg16: memref<8x256xf32, #tpu.memory_space<vmem>>, %arg17: memref<8x128xf32, #tpu.memory_space<vmem>>, %arg18: memref<8x256xf32, #tpu.memory_space<vmem>>, %arg19: memref<8x256xf32, #tpu.memory_space<vmem>>, %arg20: memref<8x128xf32, #tpu.memory_space<vmem>>) attributes {dimension_semantics = [#tpu.dimension_semantics<parallel>, #tpu.dimension_semantics<arbitrary>], iteration_bounds = array<i64: 1, 8>, scalar_prefetch = 0 : i64, scratch_operands = 3 : i64, tpu.core_type = #tpu.core_type<tc>, window_params = [{transform_indices = @transform_0, window_bounds = array<i64: 1, 8, 512>}, {transform_indices = @transform_1, window_bounds = array<i64: 1, 8, 128>}, {transform_indices = @transform_2, window_bounds = array<i64: 8, 256>}, {transform_indices = @transform_3, window_bounds = array<i64: 8, 256>}, {transform_indices = @transform_4, window_bounds = array<i64: 8, 128>}, {pipeline_mode = #tpu.pipeline_mode<synchronous>, transform_indices = @transform_5, window_bounds = array<i64: 256, 128>}, {pipeline_mode = #tpu.pipeline_mode<synchronous>, transform_indices = @transform_6, window_bounds = array<i64: 128, 256>}, {pipeline_mode = #tpu.pipeline_mode<synchronous>, transform_indices = @transform_7, window_bounds = array<i64: 1, 256>}, {pipeline_mode = #tpu.pipeline_mode<synchronous>, transform_indices = @transform_8, window_bounds = array<i64: 128, 512>}, {pipeline_mode = #tpu.pipeline_mode<synchronous>, transform_indices = @transform_9, window_bounds = array<i64: 128, 512>}, {pipeline_mode = #tpu.pipeline_mode<synchronous>, transform_indices = @transform_10, window_bounds = array<i64: 128, 512>}, {pipeline_mode = #tpu.pipeline_mode<synchronous>, transform_indices = @transform_11, window_bounds = array<i64: 1, 512>}, {transform_indices = @transform_12, window_bounds = array<i64: 1, 8, 128>}, {transform_indices = @transform_13, window_bounds = array<i64: 8, 256>}, {transform_indices = @transform_14, window_bounds = array<i64: 8, 256>}, {transform_indices = @transform_15, window_bounds = array<i64: 8, 128>}]} {
    %c0_i32 = arith.constant 0 : i32
    %0 = arith.cmpi eq, %arg1, %c0_i32 : i32
    %1 = arith.extui %0 : i1 to i32
    %c0_i32_0 = arith.constant 0 : i32
    %2 = arith.cmpi ne, %1, %c0_i32_0 : i32
    scf.if %2 {
      %c0_53 = arith.constant 0 : index
      %c0_54 = arith.constant 0 : index
      %106 = vector.load %arg4[%c0_53, %c0_54] : memref<8x256xf32, #tpu.memory_space<vmem>>, vector<8x256xf32>
      %c0_55 = arith.constant 0 : index
      %c0_56 = arith.constant 0 : index
      %107 = vector.load %arg18[%c0_55, %c0_56] : memref<8x256xf32, #tpu.memory_space<vmem>>, vector<8x256xf32>
      tpu.vector_store %arg18[%c0_55, %c0_56], %106 {strides = array<i32>} : memref<8x256xf32, #tpu.memory_space<vmem>>, vector<8x256xf32>,
      %c0_57 = arith.constant 0 : index
      %c0_58 = arith.constant 0 : index
      %108 = vector.load %arg5[%c0_57, %c0_58] : memref<8x256xf32, #tpu.memory_space<vmem>>, vector<8x256xf32>
      %c0_59 = arith.constant 0 : index
      %c0_60 = arith.constant 0 : index
      %109 = vector.load %arg19[%c0_59, %c0_60] : memref<8x256xf32, #tpu.memory_space<vmem>>, vector<8x256xf32>
      tpu.vector_store %arg19[%c0_59, %c0_60], %108 {strides = array<i32>} : memref<8x256xf32, #tpu.memory_space<vmem>>, vector<8x256xf32>,
      %c0_61 = arith.constant 0 : index
      %c0_62 = arith.constant 0 : index
      %110 = vector.load %arg6[%c0_61, %c0_62] : memref<8x128xf32, #tpu.memory_space<vmem>>, vector<8x128xf32>
      %c0_63 = arith.constant 0 : index
      %c0_64 = arith.constant 0 : index
      %111 = vector.load %arg20[%c0_63, %c0_64] : memref<8x128xf32, #tpu.memory_space<vmem>>, vector<8x128xf32>
      tpu.vector_store %arg20[%c0_63, %c0_64], %110 {strides = array<i32>} : memref<8x128xf32, #tpu.memory_space<vmem>>, vector<8x128xf32>,
    } else {
    }
    %c0 = arith.constant 0 : index
    %c0_1 = arith.constant 0 : index
    %3 = vector.load %arg18[%c0, %c0_1] : memref<8x256xf32, #tpu.memory_space<vmem>>, vector<8x256xf32>
    %c0_2 = arith.constant 0 : index
    %c0_3 = arith.constant 0 : index
    %4 = vector.load %arg20[%c0_2, %c0_3] : memref<8x128xf32, #tpu.memory_space<vmem>>, vector<8x128xf32>
    %c0_4 = arith.constant 0 : index
    %c0_5 = arith.constant 0 : index
    %5 = vector.load %arg7[%c0_4, %c0_5] : memref<256x128xf32, #tpu.memory_space<vmem>>, vector<256x128xf32>
    %cst = arith.constant dense<0.000000e+00> : vector<8x128xf32>
    %6 = tpu.matmul %3, %5, %cst {dimension_numbers = #tpu.dot_dimension_numbers<[1], [0], [0], [1], [0, 0, 1, 1], [], []>} : vector<8x256xf32>, vector<256x128xf32>, vector<8x128xf32> -> vector<8x128xf32>
    %c0_6 = arith.constant 0 : index
    %c0_7 = arith.constant 0 : index
    %c0_8 = arith.constant 0 : index
    %7 = vector.load %arg3[%c0_6, %c0_7, %c0_8] : memref<1x8x128xf32, #tpu.memory_space<vmem>>, vector<1x8x128xf32>
    %8 = vector.shape_cast %7 : vector<1x8x128xf32> to vector<8x128xf32>
    %cst_9 = arith.constant 5.000000e-01 : f32
    %9 = vector.broadcast %cst_9 : f32 to vector<8x128xf32>
    %10 = arith.mulf %9, %6 : vector<8x128xf32>
    %11 = arith.addf %8, %10 : vector<8x128xf32>
    %12 = arith.negf %11 : vector<8x128xf32>
    %13 = math.exp %12 : vector<8x128xf32>
    %cst_10 = arith.constant 1.000000e+00 : f32
    %14 = vector.broadcast %cst_10 : f32 to vector<8x128xf32>
    %15 = arith.addf %14, %13 : vector<8x128xf32>
    %16 = arith.divf %14, %15 : vector<8x128xf32>
    %17 = arith.mulf %4, %16 : vector<8x128xf32>
    %c0_11 = arith.constant 0 : index
    %c0_12 = arith.constant 0 : index
    %18 = vector.load %arg20[%c0_11, %c0_12] : memref<8x128xf32, #tpu.memory_space<vmem>>, vector<8x128xf32>
    tpu.vector_store %arg20[%c0_11, %c0_12], %17 {strides = array<i32>} : memref<8x128xf32, #tpu.memory_space<vmem>>, vector<8x128xf32>,
    %c0_13 = arith.constant 0 : index
    %c0_14 = arith.constant 0 : index
    %19 = vector.load %arg8[%c0_13, %c0_14] : memref<128x256xf32, #tpu.memory_space<vmem>>, vector<128x256xf32>
    %cst_15 = arith.constant dense<0.000000e+00> : vector<8x256xf32>
    %20 = tpu.matmul %17, %19, %cst_15 {dimension_numbers = #tpu.dot_dimension_numbers<[1], [0], [0], [1], [0, 0, 1, 1], [], []>} : vector<8x128xf32>, vector<128x256xf32>, vector<8x256xf32> -> vector<8x256xf32>
    %c0_16 = arith.constant 0 : index
    %c0_17 = arith.constant 0 : index
    %21 = vector.load %arg9[%c0_16, %c0_17] : memref<1x256xf32, #tpu.memory_space<vmem>>, vector<1x256xf32>
    %22 = vector.broadcast %21 : vector<1x256xf32> to vector<8x256xf32>
    %23 = arith.addf %20, %22 : vector<8x256xf32>
    %24 = math.tanh %23 : vector<8x256xf32>
    %25 = vector.extract_strided_slice %3 {offsets = [0, 0], sizes = [8, 128], strides = [1, 1]} : vector<8x256xf32> to vector<8x128xf32>
    %c0_18 = arith.constant 0 : index
    %c0_19 = arith.constant 0 : index
    %26 = vector.load %arg19[%c0_18, %c0_19] : memref<8x256xf32, #tpu.memory_space<vmem>>, vector<8x128xf32>
    %c0_20 = arith.constant 0 : index
    %c0_21 = arith.constant 0 : index
    %27 = vector.load %arg10[%c0_20, %c0_21] : memref<128x512xf32, #tpu.memory_space<vmem>>, vector<128x512xf32>
    %cst_22 = arith.constant dense<0.000000e+00> : vector<8x512xf32>
    %28 = tpu.matmul %25, %27, %cst_22 {dimension_numbers = #tpu.dot_dimension_numbers<[1], [0], [0], [1], [0, 0, 1, 1], [], []>} : vector<8x128xf32>, vector<128x512xf32>, vector<8x512xf32> -> vector<8x512xf32>
    %c0_23 = arith.constant 0 : index
    %c0_24 = arith.constant 0 : index
    %c0_25 = arith.constant 0 : index
    %29 = vector.load %arg2[%c0_23, %c0_24, %c0_25] : memref<1x8x512xf32, #tpu.memory_space<vmem>>, vector<1x8x512xf32>
    %30 = vector.shape_cast %29 : vector<1x8x512xf32> to vector<8x512xf32>
    %31 = arith.addf %30, %28 : vector<8x512xf32>
    %32 = vector.extract_strided_slice %31 {offsets = [0, 0], sizes = [8, 128], strides = [1, 1]} : vector<8x512xf32> to vector<8x128xf32>
    %33 = arith.negf %32 : vector<8x128xf32>
    %34 = math.exp %33 : vector<8x128xf32>
    %cst_26 = arith.constant 1.000000e+00 : f32
    %35 = vector.broadcast %cst_26 : f32 to vector<8x128xf32>
    %36 = arith.addf %35, %34 : vector<8x128xf32>
    %37 = arith.divf %35, %36 : vector<8x128xf32>
    %38 = vector.extract_strided_slice %31 {offsets = [0, 128], sizes = [8, 128], strides = [1, 1]} : vector<8x512xf32> to vector<8x128xf32>
    %39 = arith.negf %38 : vector<8x128xf32>
    %40 = math.exp %39 : vector<8x128xf32>
    %cst_27 = arith.constant 1.000000e+00 : f32
    %41 = vector.broadcast %cst_27 : f32 to vector<8x128xf32>
    %42 = arith.addf %41, %40 : vector<8x128xf32>
    %43 = arith.divf %41, %42 : vector<8x128xf32>
    %44 = vector.extract_strided_slice %31 {offsets = [0, 256], sizes = [8, 128], strides = [1, 1]} : vector<8x512xf32> to vector<8x128xf32>
    %45 = arith.negf %44 : vector<8x128xf32>
    %46 = math.exp %45 : vector<8x128xf32>
    %cst_28 = arith.constant 1.000000e+00 : f32
    %47 = vector.broadcast %cst_28 : f32 to vector<8x128xf32>
    %48 = arith.addf %47, %46 : vector<8x128xf32>
    %49 = arith.divf %47, %48 : vector<8x128xf32>
    %50 = vector.extract_strided_slice %31 {offsets = [0, 384], sizes = [8, 128], strides = [1, 1]} : vector<8x512xf32> to vector<8x128xf32>
    %51 = math.tanh %50 : vector<8x128xf32>
    %52 = arith.mulf %43, %26 : vector<8x128xf32>
    %53 = arith.mulf %37, %51 : vector<8x128xf32>
    %54 = arith.addf %52, %53 : vector<8x128xf32>
    %55 = vector.extract_strided_slice %24 {offsets = [0, 0], sizes = [8, 128], strides = [1, 1]} : vector<8x256xf32> to vector<8x128xf32>
    %56 = arith.addf %54, %55 : vector<8x128xf32>
    %57 = math.tanh %56 : vector<8x128xf32>
    %58 = arith.mulf %49, %57 : vector<8x128xf32>
    %c0_29 = arith.constant 0 : index
    %c0_30 = arith.constant 0 : index
    %59 = vector.load %arg19[%c0_29, %c0_30] : memref<8x256xf32, #tpu.memory_space<vmem>>, vector<8x128xf32>
    tpu.vector_store %arg19[%c0_29, %c0_30], %56 {strides = array<i32>} : memref<8x256xf32, #tpu.memory_space<vmem>>, vector<8x128xf32>,
    %c0_31 = arith.constant 0 : index
    %c0_32 = arith.constant 0 : index
    %60 = vector.load %arg18[%c0_31, %c0_32] : memref<8x256xf32, #tpu.memory_space<vmem>>, vector<8x128xf32>
    tpu.vector_store %arg18[%c0_31, %c0_32], %58 {strides = array<i32>} : memref<8x256xf32, #tpu.memory_space<vmem>>, vector<8x128xf32>,
    %61 = vector.extract_strided_slice %3 {offsets = [0, 128], sizes = [8, 128], strides = [1, 1]} : vector<8x256xf32> to vector<8x128xf32>
    %c0_33 = arith.constant 0 : index
    %c128 = arith.constant 128 : index
    %62 = vector.load %arg19[%c0_33, %c128] : memref<8x256xf32, #tpu.memory_space<vmem>>, vector<8x128xf32>
    %c0_34 = arith.constant 0 : index
    %c0_35 = arith.constant 0 : index
    %63 = vector.load %arg11[%c0_34, %c0_35] : memref<128x512xf32, #tpu.memory_space<vmem>>, vector<128x512xf32>
    %cst_36 = arith.constant dense<0.000000e+00> : vector<8x512xf32>
    %64 = tpu.matmul %61, %63, %cst_36 {dimension_numbers = #tpu.dot_dimension_numbers<[1], [0], [0], [1], [0, 0, 1, 1], [], []>} : vector<8x128xf32>, vector<128x512xf32>, vector<8x512xf32> -> vector<8x512xf32>
    %c0_37 = arith.constant 0 : index
    %c0_38 = arith.constant 0 : index
    %65 = vector.load %arg12[%c0_37, %c0_38] : memref<128x512xf32, #tpu.memory_space<vmem>>, vector<128x512xf32>
    %cst_39 = arith.constant dense<0.000000e+00> : vector<8x512xf32>
    %66 = tpu.matmul %58, %65, %cst_39 {dimension_numbers = #tpu.dot_dimension_numbers<[1], [0], [0], [1], [0, 0, 1, 1], [], []>} : vector<8x128xf32>, vector<128x512xf32>, vector<8x512xf32> -> vector<8x512xf32>
    %67 = arith.addf %66, %64 : vector<8x512xf32>
    %c0_40 = arith.constant 0 : index
    %c0_41 = arith.constant 0 : index
    %68 = vector.load %arg13[%c0_40, %c0_41] : memref<1x512xf32, #tpu.memory_space<vmem>>, vector<1x512xf32>
    %69 = vector.broadcast %68 : vector<1x512xf32> to vector<8x512xf32>
    %70 = arith.addf %67, %69 : vector<8x512xf32>
    %71 = vector.extract_strided_slice %70 {offsets = [0, 0], sizes = [8, 128], strides = [1, 1]} : vector<8x512xf32> to vector<8x128xf32>
    %72 = arith.negf %71 : vector<8x128xf32>
    %73 = math.exp %72 : vector<8x128xf32>
    %cst_42 = arith.constant 1.000000e+00 : f32
    %74 = vector.broadcast %cst_42 : f32 to vector<8x128xf32>
    %75 = arith.addf %74, %73 : vector<8x128xf32>
    %76 = arith.divf %74, %75 : vector<8x128xf32>
    %77 = vector.extract_strided_slice %70 {offsets = [0, 128], sizes = [8, 128], strides = [1, 1]} : vector<8x512xf32> to vector<8x128xf32>
    %78 = arith.negf %77 : vector<8x128xf32>
    %79 = math.exp %78 : vector<8x128xf32>
    %cst_43 = arith.constant 1.000000e+00 : f32
    %80 = vector.broadcast %cst_43 : f32 to vector<8x128xf32>
    %81 = arith.addf %80, %79 : vector<8x128xf32>
    %82 = arith.divf %80, %81 : vector<8x128xf32>
    %83 = vector.extract_strided_slice %70 {offsets = [0, 256], sizes = [8, 128], strides = [1, 1]} : vector<8x512xf32> to vector<8x128xf32>
    %84 = arith.negf %83 : vector<8x128xf32>
    %85 = math.exp %84 : vector<8x128xf32>
    %cst_44 = arith.constant 1.000000e+00 : f32
    %86 = vector.broadcast %cst_44 : f32 to vector<8x128xf32>
    %87 = arith.addf %86, %85 : vector<8x128xf32>
    %88 = arith.divf %86, %87 : vector<8x128xf32>
    %89 = vector.extract_strided_slice %70 {offsets = [0, 384], sizes = [8, 128], strides = [1, 1]} : vector<8x512xf32> to vector<8x128xf32>
    %90 = math.tanh %89 : vector<8x128xf32>
    %91 = arith.mulf %82, %62 : vector<8x128xf32>
    %92 = arith.mulf %76, %90 : vector<8x128xf32>
    %93 = arith.addf %91, %92 : vector<8x128xf32>
    %94 = vector.extract_strided_slice %24 {offsets = [0, 128], sizes = [8, 128], strides = [1, 1]} : vector<8x256xf32> to vector<8x128xf32>
    %95 = arith.addf %93, %94 : vector<8x128xf32>
    %96 = math.tanh %95 : vector<8x128xf32>
    %97 = arith.mulf %88, %96 : vector<8x128xf32>
    %c0_45 = arith.constant 0 : index
    %c128_46 = arith.constant 128 : index
    %98 = vector.load %arg19[%c0_45, %c128_46] : memref<8x256xf32, #tpu.memory_space<vmem>>, vector<8x128xf32>
    tpu.vector_store %arg19[%c0_45, %c128_46], %95 {strides = array<i32>} : memref<8x256xf32, #tpu.memory_space<vmem>>, vector<8x128xf32>,
    %c0_47 = arith.constant 0 : index
    %c128_48 = arith.constant 128 : index
    %99 = vector.load %arg18[%c0_47, %c128_48] : memref<8x256xf32, #tpu.memory_space<vmem>>, vector<8x128xf32>
    tpu.vector_store %arg18[%c0_47, %c128_48], %97 {strides = array<i32>} : memref<8x256xf32, #tpu.memory_space<vmem>>, vector<8x128xf32>,
    %c0_49 = arith.constant 0 : index
    %c0_50 = arith.constant 0 : index
    %c0_51 = arith.constant 0 : index
    %100 = vector.load %arg14[%c0_49, %c0_50, %c0_51] : memref<1x8x128xf32, #tpu.memory_space<vmem>>, vector<1x8x128xf32>
    %101 = vector.shape_cast %100 : vector<1x8x128xf32> to vector<8x128xf32>
    %102 = vector.shape_cast %97 : vector<8x128xf32> to vector<1x8x128xf32>
    tpu.vector_store %arg14[%c0_49, %c0_50, %c0_51], %102 {strides = array<i32>} : memref<1x8x128xf32, #tpu.memory_space<vmem>>, vector<1x8x128xf32>,
    %c7_i32 = arith.constant 7 : i32
    %103 = arith.cmpi eq, %arg1, %c7_i32 : i32
    %104 = arith.extui %103 : i1 to i32
    %c0_i32_52 = arith.constant 0 : i32
    %105 = arith.cmpi ne, %104, %c0_i32_52 : i32
    scf.if %105 {
      %c0_53 = arith.constant 0 : index
      %c0_54 = arith.constant 0 : index
      %106 = vector.load %arg18[%c0_53, %c0_54] : memref<8x256xf32, #tpu.memory_space<vmem>>, vector<8x256xf32>
      %c0_55 = arith.constant 0 : index
      %c0_56 = arith.constant 0 : index
      %107 = vector.load %arg15[%c0_55, %c0_56] : memref<8x256xf32, #tpu.memory_space<vmem>>, vector<8x256xf32>
      tpu.vector_store %arg15[%c0_55, %c0_56], %106 {strides = array<i32>} : memref<8x256xf32, #tpu.memory_space<vmem>>, vector<8x256xf32>,
      %c0_57 = arith.constant 0 : index
      %c0_58 = arith.constant 0 : index
      %108 = vector.load %arg19[%c0_57, %c0_58] : memref<8x256xf32, #tpu.memory_space<vmem>>, vector<8x256xf32>
      %c0_59 = arith.constant 0 : index
      %c0_60 = arith.constant 0 : index
      %109 = vector.load %arg16[%c0_59, %c0_60] : memref<8x256xf32, #tpu.memory_space<vmem>>, vector<8x256xf32>
      tpu.vector_store %arg16[%c0_59, %c0_60], %108 {strides = array<i32>} : memref<8x256xf32, #tpu.memory_space<vmem>>, vector<8x256xf32>,
      %c0_61 = arith.constant 0 : index
      %c0_62 = arith.constant 0 : index
      %110 = vector.load %arg20[%c0_61, %c0_62] : memref<8x128xf32, #tpu.memory_space<vmem>>, vector<8x128xf32>
      %c0_63 = arith.constant 0 : index
      %c0_64 = arith.constant 0 : index
      %111 = vector.load %arg17[%c0_63, %c0_64] : memref<8x128xf32, #tpu.memory_space<vmem>>, vector<8x128xf32>
      tpu.vector_store %arg17[%c0_63, %c0_64], %110 {strides = array<i32>} : memref<8x128xf32, #tpu.memory_space<vmem>>, vector<8x128xf32>,
    } else {
    }
    return
  }
  func.func @transform_0(%arg0: i32, %arg1: i32) -> (i32, i32, i32) {
    %c0_i32 = arith.constant 0 : i32
    %c0_i32_0 = arith.constant 0 : i32
    return %arg1, %arg0, %c0_i32 : i32, i32, i32
  }
  func.func @transform_1(%arg0: i32, %arg1: i32) -> (i32, i32, i32) {
    %c0_i32 = arith.constant 0 : i32
    %c0_i32_0 = arith.constant 0 : i32
    return %arg1, %arg0, %c0_i32 : i32, i32, i32
  }
  func.func @transform_2(%arg0: i32, %arg1: i32) -> (i32, i32) {
    %c0_i32 = arith.constant 0 : i32
    %c0_i32_0 = arith.constant 0 : i32
    return %arg0, %c0_i32 : i32, i32
  }
  func.func @transform_3(%arg0: i32, %arg1: i32) -> (i32, i32) {
    %c0_i32 = arith.constant 0 : i32
    %c0_i32_0 = arith.constant 0 : i32
    return %arg0, %c0_i32 : i32, i32
  }
  func.func @transform_4(%arg0: i32, %arg1: i32) -> (i32, i32) {
    %c0_i32 = arith.constant 0 : i32
    %c0_i32_0 = arith.constant 0 : i32
    return %arg0, %c0_i32 : i32, i32
  }
  func.func @transform_5(%arg0: i32, %arg1: i32) -> (i32, i32) {
    %c0_i32 = arith.constant 0 : i32
    %c0_i32_0 = arith.constant 0 : i32
    %c0_i32_1 = arith.constant 0 : i32
    return %c0_i32, %c0_i32_0 : i32, i32
  }
  func.func @transform_6(%arg0: i32, %arg1: i32) -> (i32, i32) {
    %c0_i32 = arith.constant 0 : i32
    %c0_i32_0 = arith.constant 0 : i32
    %c0_i32_1 = arith.constant 0 : i32
    return %c0_i32, %c0_i32_0 : i32, i32
  }
  func.func @transform_7(%arg0: i32, %arg1: i32) -> (i32, i32) {
    %c0_i32 = arith.constant 0 : i32
    %c0_i32_0 = arith.constant 0 : i32
    %c0_i32_1 = arith.constant 0 : i32
    return %c0_i32, %c0_i32_0 : i32, i32
  }
  func.func @transform_8(%arg0: i32, %arg1: i32) -> (i32, i32) {
    %c0_i32 = arith.constant 0 : i32
    %c0_i32_0 = arith.constant 0 : i32
    %c0_i32_1 = arith.constant 0 : i32
    return %c0_i32, %c0_i32_0 : i32, i32
  }
  func.func @transform_9(%arg0: i32, %arg1: i32) -> (i32, i32) {
    %c0_i32 = arith.constant 0 : i32
    %c0_i32_0 = arith.constant 0 : i32
    %c0_i32_1 = arith.constant 0 : i32
    return %c0_i32, %c0_i32_0 : i32, i32
  }
  func.func @transform_10(%arg0: i32, %arg1: i32) -> (i32, i32) {
    %c0_i32 = arith.constant 0 : i32
    %c0_i32_0 = arith.constant 0 : i32
    %c0_i32_1 = arith.constant 0 : i32
    return %c0_i32, %c0_i32_0 : i32, i32
  }
  func.func @transform_11(%arg0: i32, %arg1: i32) -> (i32, i32) {
    %c0_i32 = arith.constant 0 : i32
    %c0_i32_0 = arith.constant 0 : i32
    %c0_i32_1 = arith.constant 0 : i32
    return %c0_i32, %c0_i32_0 : i32, i32
  }
  func.func @transform_12(%arg0: i32, %arg1: i32) -> (i32, i32, i32) {
    %c0_i32 = arith.constant 0 : i32
    %c0_i32_0 = arith.constant 0 : i32
    return %arg1, %arg0, %c0_i32 : i32, i32, i32
  }
  func.func @transform_13(%arg0: i32, %arg1: i32) -> (i32, i32) {
    %c0_i32 = arith.constant 0 : i32
    %c0_i32_0 = arith.constant 0 : i32
    return %arg0, %c0_i32 : i32, i32
  }
  func.func @transform_14(%arg0: i32, %arg1: i32) -> (i32, i32) {
    %c0_i32 = arith.constant 0 : i32
    %c0_i32_0 = arith.constant 0 : i32
    return %arg0, %c0_i32 : i32, i32
  }
  func.func @transform_15(%arg0: i32, %arg1: i32) -> (i32, i32) {
    %c0_i32 = arith.constant 0 : i32
    %c0_i32_0 = arith.constant 0 : i32
    return %arg0, %c0_i32 : i32, i32
  }
}

</mosaic_0001>

<bundles_post_ra>
// kernel: tpu_custom_call.1
= control target key start
LH: loop header
LB: loop body
LE: loop exit
PB: predicated region body
PF: predicated region fallthrough
CT: control target
= control target key end

     0   :  { %s3570_s0 = inlined_call_operand.hbm [shape: f32[8,8,512], index: 0, kind: input, shape index: {}]   ;;  %s3571_s1 = inlined_call_operand.hbm [shape: f32[8,8,128], index: 1, kind: input, shape index: {}]   ;;  %s3572_s2 = inlined_call_operand.hbm [shape: f32[8,256], index: 2, kind: input, shape index: {}]   ;;  %s3573_s3 = inlined_call_operand.hbm [shape: f32[8,256], index: 3, kind: input, shape index: {}]   ;;  %s3574_s4 = inlined_call_operand.vmem [shape: f32[8,128], index: 4, kind: input, shape index: {}]   ;;  %s3575_s5 = inlined_call_operand.hbm [shape: f32[256,128], index: 5, kind: input, shape index: {}]   ;;  %s3576_s6 = inlined_call_operand.hbm [shape: f32[128,256], index: 6, kind: input, shape index: {}]   ;;  %s3577_s7 = inlined_call_operand.vmem [shape: f32[1,256], index: 7, kind: input, shape index: {}]   ;;  %s3578_s8 = inlined_call_operand.hbm [shape: f32[128,512], index: 8, kind: input, shape index: {}]   ;;  %s3579_s9 = inlined_call_operand.hbm [shape: f32[128,512], index: 9, kind: input, shape index: {}]   ;;  %s3580_s10 = inlined_call_operand.hbm [shape: f32[128,512], index: 10, kind: input, shape index: {}]   ;;  %s3581_s11 = inlined_call_operand.vmem [shape: f32[1,512], index: 11, kind: input, shape index: {}]   ;;  %s3582_s12 = inlined_call_operand.hbm [shape: f32[8,8,128], index: 12, kind: output, shape index: {0}]   ;;  %s3583_s13 = inlined_call_operand.hbm [shape: f32[8,256], index: 13, kind: output, shape index: {1}]   ;;  %s3584_s14 = inlined_call_operand.hbm [shape: f32[8,256], index: 14, kind: output, shape index: {2}]   ;;  %s3585_s15 = inlined_call_operand.hbm [shape: f32[8,128], index: 15, kind: output, shape index: {3}]  }
   0x1   :  { %3600 = sst [smem:[#allocation37_spill]] %s3570_s0 }
   0x2   :  { %3601 = sst [smem:[#allocation38_spill]] %s3572_s2 }
   0x3   :  { %3602 = sst [smem:[#allocation39_spill]] %s3573_s3 }
   0x4   :  { %3603 = sst [smem:[#allocation40_spill]] %s3574_s4 }
   0x5   :  { %3604 = sst [smem:[#allocation41_spill]] %s3575_s5 }
   0x6   :  { %3605 = sst [smem:[#allocation42_spill]] %s3577_s7 }
   0x7   :  { %3606 = sst [smem:[#allocation43_spill]] %s3581_s11 }
   0x8   :  { %3607 = sst [smem:[#allocation44_spill]] %s3582_s12 }
   0x9   :  { %3608 = sst [smem:[#allocation45_spill]] %s3583_s13 }
   0xa   :  { %3609 = sst [smem:[#allocation46_spill]] %s3584_s14 }
   0xb   :  { %3610 = sst [smem:[#allocation47_spill]] %s3585_s15 }
   0xc   :  { %21 = vsyncpa [#allocation6], 0 }
   0xd   :  { %23 = vsyncpa [#allocation6 + $0x1], 0 }
   0xe   :  { %24 = vsyncpa [#allocation9], 0 }
   0xf   :  { %26 = vsyncpa [#allocation9 + $0x1], 0 }
  0x10   :  { %27 = vsyncpa [#allocation12], 0 }
  0x11   :  { %28 = vsyncpa [#allocation15], 0 }
  0x12   :  { %29 = vsyncpa [#allocation18], 0 }
  0x13   :  { %30 = vsyncpa [#allocation7], 0 }
  0x14   :  { %32 = vsyncpa [#allocation7 + $0x1], 0 }
  0x15   :  { %33 = vsyncpa [#allocation22], 0 }
  0x16   :  { %34 = vsyncpa [#allocation25], 0  ;;  %s3058_s18 = smov 0   ;;  %s3060_s19 = smov 0  }
  0x17   :  { %s3062_s20 = smov 0   ;;  %s3064_s21 = smov 0  }
  0x18   :  { %s3066_s22 = smov 0   ;;  %s3068_s23 = smov 0  }
  0x19 LB: > { %3611 = sst [smem:[#allocation35_spill]] %s2948_s21  ;;  %s3089_s24 = sadd.s32 4294967295, %s2956_s23   ;;  %s2956_s23 = sphi %s3068_s23, %s40_s23   ;;  %s2952_s22 = sphi %s3066_s22, %s3669_s22   ;;  %s2948_s21 = sphi %s3064_s21, %s3668_s21   ;;  %s2944_s20 = sphi %s3062_s20, %s3667_s20   ;;  %s2940_s19 = sphi %s3060_s19, %s3666_s19   ;;  %s2936_s18 = sphi %s3058_s18, %s3665_s18  }
  0x1a   : > { %p1965_p0 = scmp.ge.s32.totalorder %s2956_s23, 1  ;;  %p3590_p1 = scmp.eq.s32.totalorder %s3089_s24, 0 }
  0x1b   : > { %p444_p2 = scmp.lt.s32.totalorder %s2956_s23, 9  ;;  %s2958_s26 = smov [#allocation10]  }
  0x1c   : > { %s460_s27 = sshll.u32 %s2958_s26, 4  ;;  %s2959_s28 = smov [#allocation11]   ;;  %s461_s27 = int_to_ptr.vmem [resolvable:$true] %s460_s27 }
  0x1d   : > { %p3094_p3 = pnand %p1965_p0, %p444_p2  ;;  %s474_s29 = sshll.u32 %s2959_s28, 4  ;;  %s3106_s29 = int_to_ptr.vmem [resolvable:$true] %s474_s29 }
  0x1e   : > { %s2960_s16 = smov [#allocation14]   ;;  %s3615_s2 = sld [smem:[#allocation38_spill]] }
  0x1f   : > { %s3612_s25 = scalar_select %p3094_p3, 1, 0 }
  0x20   : > { %p2352_p4 = pneg %p3094_p3  ;;  %s504_s17 = sshll.u32 %s2960_s16, 4  ;;  %s3108_s17 = int_to_ptr.vmem [resolvable:$true] %s504_s17 }
  0x21   : > { %3613 = sst [smem:[#allocation36_spill]] %s3612_s25 }
  0x22   : > { %p3102_p5 = pnand %p2352_p4, %p3590_p1 }
  0x24   : > { %s2512_s26 = scalar_lea.hbm %s3615_s2, 256  ;;  %p3118_p7 = pneg %p3102_p5 }
  0x25   : > { %p2513_p6 = scmp.ne.s32.totalorder %s3615_s2, %s2512_s26  ;;  %p2519_p10 = scmp.lt.u32.totalorder %s2512_s26, %s3615_s2 }
  0x27   : > { %p2515_p8 = pnand %p3118_p7, %p2513_p6 }
  0x29   : > { %p2516_p9 = pneg %p2515_p8 }
  0x2b   : > { %p2521_p11 = pnand %p2519_p10, %p2516_p9 }
  0x2d   : > { %2524 = shalt.err (!%p2521_p11)
}
  0x2e   : > { %s2525_s14 = scalar_lea.vmem %s461_s27, 256  ;;  %p2533_p2 = scmp.lt.s32.totalorder %s461_s27, %s461_s27 }
  0x2f   : > { %p2526_p12 = scmp.ne.s32.totalorder %s461_s27, %s2525_s14  ;;  %p2534_p4 = scmp.lt.s32.totalorder %s2525_s14, %s2525_s14 }
  0x31   : > { %p2528_p13 = pnand %p2526_p12, %p3118_p7  ;;  %p2535_p1 = por %p2534_p4, %p2533_p2 }
  0x33   : > { %p2529_p0 = pneg %p2528_p13 }
  0x35   : > { %p2536_p3 = pnand %p2535_p1, %p2529_p0 }
  0x37   : > { %2539 = shalt.err (!%p2536_p3)
}
  0x38   : > { %2355 = dma.hbm_to_vmem [thread:$0]  (!%p3102_p5), %s3615_s2, 256, %s461_s27, [#allocation9]  }
  0x39   : > { %s3617_s3 = sld [smem:[#allocation39_spill]] }
  0x3f   : > { %s2540_s26 = scalar_lea.hbm %s3617_s3, 256 }
  0x40   : > { %p2541_p6 = scmp.ne.s32.totalorder %s3617_s3, %s2540_s26  ;;  %p2547_p1 = scmp.lt.u32.totalorder %s2540_s26, %s3617_s3 }
  0x42   : > { %p2543_p8 = pnand %p2541_p6, %p3118_p7 }
  0x44   : > { %p2544_p9 = pneg %p2543_p8 }
  0x46   : > { %p2549_p3 = pnand %p2547_p1, %p2544_p9 }
  0x48   : > { %2552 = shalt.err (!%p2549_p3)
}
  0x49   : > { %s2553_s27 = scalar_lea.vmem %s3106_s29, 256  ;;  %p2561_p13 = scmp.lt.s32.totalorder %s3106_s29, %s3106_s29 }
  0x4a   : > { %p2554_p10 = scmp.ne.s32.totalorder %s3106_s29, %s2553_s27  ;;  %p2562_p0 = scmp.lt.s32.totalorder %s2553_s27, %s2553_s27 }
  0x4c   : > { %p2556_p11 = pnand %p2554_p10, %p3118_p7  ;;  %p2563_p2 = por %p2562_p0, %p2561_p13 }
  0x4e   : > { %p2557_p12 = pneg %p2556_p11 }
  0x50   : > { %p2564_p4 = pnand %p2563_p2, %p2557_p12 }
  0x52   : > { %2567 = shalt.err (!%p2564_p4)
}
  0x53   : > { %2358 = dma.hbm_to_vmem [thread:$0]  (!%p3102_p5), %s3617_s3, 256, %s3106_s29, [#allocation12]  }
  0x54   : > { %s2568_s11 = scalar_lea.hbm %s3576_s6, 4096 }
  0x55   : > { %p2569_p6 = scmp.ne.s32.totalorder %s3576_s6, %s2568_s11  ;;  %p2575_p1 = scmp.lt.u32.totalorder %s2568_s11, %s3576_s6 }
  0x57   : > { %p2571_p8 = pnand %p2569_p6, %p3118_p7 }
  0x59   : > { %p2572_p9 = pneg %p2571_p8 }
  0x5b   : > { %p2577_p3 = pnand %p2575_p1, %p2572_p9 }
  0x5d   : > { %2580 = shalt.err (!%p2577_p3)
}
  0x5e   : > { %s2581_s29 = scalar_lea.vmem %s3108_s17, 4096  ;;  %p2589_p13 = scmp.lt.s32.totalorder %s3108_s17, %s3108_s17 }
  0x5f   : > { %p2582_p10 = scmp.ne.s32.totalorder %s3108_s17, %s2581_s29  ;;  %p2590_p0 = scmp.lt.s32.totalorder %s2581_s29, %s2581_s29 }
  0x61   : > { %p2584_p11 = pnand %p2582_p10, %p3118_p7  ;;  %p2591_p2 = por %p2590_p0, %p2589_p13 }
  0x63   : > { %p2585_p12 = pneg %p2584_p11 }
  0x65   : > { %p2592_p4 = pnand %p2591_p2, %p2585_p12 }
  0x67   : > { %2595 = shalt.err (!%p2592_p4)
}
  0x68   : > { %s2961_s27 = smov 256   ;;  %s2962_s4 = smov 16  }
  0x69   : > { %2364 = dma.hbm_to_vmem [thread:$0]  (!%p3102_p5), %s3576_s6, 4096, %s3108_s17, [#allocation15], %s2961_s27, %s2961_s27, %s2962_s4  }
  0x6a   : > { %s2963_s13 = smov [#allocation17]   ;;  %s2964_s15 = smov [#allocation13]  }
  0x6b   : > { %s533_s11 = sshll.u32 %s2963_s13, 4  ;;  %s491_s26 = sshll.u32 %s2964_s15, 4  ;;  %s534_s11 = int_to_ptr.vmem [resolvable:$true] %s533_s11  ;;  %s492_s26 = int_to_ptr.vmem [resolvable:$true] %s491_s26 }
  0x6c   : > { %s2596_s29 = scalar_lea.hbm %s3579_s9, 8192 }
  0x6d   : > { %p2597_p6 = scmp.ne.s32.totalorder %s3579_s9, %s2596_s29  ;;  %p2603_p1 = scmp.lt.u32.totalorder %s2596_s29, %s3579_s9 }
  0x6f   : > { %p2599_p8 = pnand %p2597_p6, %p3118_p7 }
  0x71   : > { %p2600_p9 = pneg %p2599_p8 }
  0x73   : > { %p2605_p3 = pnand %p2603_p1, %p2600_p9 }
  0x75   : > { %2608 = shalt.err (!%p2605_p3)
}
  0x76   : > { %s2609_s17 = scalar_lea.vmem %s534_s11, 8192  ;;  %p2617_p13 = scmp.lt.s32.totalorder %s534_s11, %s534_s11 }
  0x77   : > { %p2610_p10 = scmp.ne.s32.totalorder %s534_s11, %s2609_s17  ;;  %p2618_p0 = scmp.lt.s32.totalorder %s2609_s17, %s2609_s17 }
  0x79   : > { %p2612_p11 = pnand %p2610_p10, %p3118_p7  ;;  %p2619_p2 = por %p2618_p0, %p2617_p13 }
  0x7b   : > { %p2613_p12 = pneg %p2612_p11 }
  0x7d   : > { %p2620_p4 = pnand %p2619_p2, %p2613_p12 }
  0x7f   : > { %2623 = shalt.err (!%p2620_p4)
}
  0x80   : > { %s3593_s2 = smov 512   ;;  %s3595_s3 = smov 32  }
  0x81   : > { %2370 = dma.hbm_to_vmem [thread:$0]  (!%p3102_p5), %s3579_s9, 8192, %s534_s11, [#allocation18], %s3593_s2, %s3593_s2, %s3595_s3  }
  0x82   : > { %s3618_s5 = sld [smem:[#allocation41_spill]] }
  0x88   : > { %s2624_s7 = scalar_lea.hbm %s3618_s5, 4096 }
  0x89   : > { %p2625_p6 = scmp.ne.s32.totalorder %s3618_s5, %s2624_s7  ;;  %p2631_p1 = scmp.lt.u32.totalorder %s2624_s7, %s3618_s5 }
  0x8b   : > { %p2627_p8 = pnand %p2625_p6, %p3118_p7 }
  0x8d   : > { %p2628_p9 = pneg %p2627_p8 }
  0x8f   : > { %p2633_p3 = pnand %p2631_p1, %p2628_p9 }
  0x91   : > { %2636 = shalt.err (!%p2633_p3)
}
  0x92   : > { %s2637_s14 = scalar_lea.vmem %s492_s26, 4096  ;;  %p2645_p13 = scmp.lt.s32.totalorder %s492_s26, %s492_s26 }
  0x93   : > { %p2638_p10 = scmp.ne.s32.totalorder %s492_s26, %s2637_s14  ;;  %p2646_p0 = scmp.lt.s32.totalorder %s2637_s14, %s2637_s14 }
  0x95   : > { %p2640_p11 = pnand %p2638_p10, %p3118_p7  ;;  %p2647_p2 = por %p2646_p0, %p2645_p13 }
  0x97   : > { %p2641_p12 = pneg %p2640_p11 }
  0x99   : > { %p2648_p4 = pnand %p2647_p2, %p2641_p12 }
  0x9b   : > { %2651 = shalt.err (!%p2648_p4)
}
  0x9c   : > { %s2967_s11 = smov 128   ;;  %s2968_s29 = smov 8  }
  0x9d   : > { %2361 = dma.hbm_to_vmem [thread:$0]  (!%p3102_p5), %s3618_s5, 4096, %s492_s26, [#allocation12], %s2967_s11, %s2967_s11, %s2968_s29  }
  0x9e   : > { %s2969_s25 = smov [#allocation16]   ;;  %s2970_s4 = smov [#allocation19]  }
  0x9f   : > { %s520_s27 = sshll.u32 %s2969_s25, 4  ;;  %s546_s7 = sshll.u32 %s2970_s4, 4  ;;  %s521_s27 = int_to_ptr.vmem [resolvable:$true] %s520_s27  ;;  %s547_s7 = int_to_ptr.vmem [resolvable:$true] %s546_s7 }
  0xa0   : > { %s2652_s15 = scalar_lea.hbm %s3578_s8, 8192 }
  0xa1   : > { %p2653_p6 = scmp.ne.s32.totalorder %s3578_s8, %s2652_s15  ;;  %p2659_p1 = scmp.lt.u32.totalorder %s2652_s15, %s3578_s8 }
  0xa3   : > { %p2655_p8 = pnand %p2653_p6, %p3118_p7 }
  0xa5   : > { %p2656_p9 = pneg %p2655_p8 }
  0xa7   : > { %p2661_p3 = pnand %p2659_p1, %p2656_p9 }
  0xa9   : > { %2664 = shalt.err (!%p2661_p3)
}
  0xaa   : > { %s2665_s26 = scalar_lea.vmem %s521_s27, 8192  ;;  %p2673_p13 = scmp.lt.s32.totalorder %s521_s27, %s521_s27 }
  0xab   : > { %p2666_p10 = scmp.ne.s32.totalorder %s521_s27, %s2665_s26  ;;  %p2674_p0 = scmp.lt.s32.totalorder %s2665_s26, %s2665_s26 }
  0xad   : > { %p2668_p11 = pnand %p2666_p10, %p3118_p7  ;;  %p2675_p2 = por %p2674_p0, %p2673_p13 }
  0xaf   : > { %p2669_p12 = pneg %p2668_p11 }
  0xb1   : > { %p2676_p4 = pnand %p2675_p2, %p2669_p12 }
  0xb3   : > { %2679 = shalt.err (!%p2676_p4)
}
  0xb4   : > { %s3619_s11 = smov 32   ;;  %s3620_s29 = smov 512  }
  0xb5   : > { %2367 = dma.hbm_to_vmem [thread:$0]  (!%p3102_p5), %s3578_s8, 8192, %s521_s27, [#allocation15], %s3620_s29, %s3620_s29, %s3619_s11  }
  0xb6   : > { %s2680_s25 = scalar_lea.hbm %s3580_s10, 8192 }
  0xb7   : > { %p2681_p6 = scmp.ne.s32.totalorder %s3580_s10, %s2680_s25  ;;  %p2687_p1 = scmp.lt.u32.totalorder %s2680_s25, %s3580_s10 }
  0xb9   : > { %p2683_p8 = pnand %p2681_p6, %p3118_p7 }
  0xbb   : > { %p2684_p9 = pneg %p2683_p8 }
  0xbd   : > { %p2689_p3 = pnand %p2687_p1, %p2684_p9 }
  0xbf   : > { %2692 = shalt.err (!%p2689_p3)
}
  0xc0   : > { %s2693_s16 = scalar_lea.vmem %s547_s7, 8192  ;;  %p2701_p13 = scmp.lt.s32.totalorder %s547_s7, %s547_s7 }
  0xc1   : > { %p2694_p10 = scmp.ne.s32.totalorder %s547_s7, %s2693_s16  ;;  %p2702_p0 = scmp.lt.s32.totalorder %s2693_s16, %s2693_s16 }
  0xc3   : > { %p2696_p11 = pnand %p2694_p10, %p3118_p7  ;;  %p2703_p2 = por %p2702_p0, %p2701_p13 }
  0xc5   : > { %p2697_p12 = pneg %p2696_p11 }
  0xc7   : > { %p2704_p4 = pnand %p2703_p2, %p2697_p12 }
  0xc9   : > { %2707 = shalt.err (!%p2704_p4)
}
  0xca   : > { %2373 = dma.hbm_to_vmem [thread:$0]  (!%p3102_p5), %s3580_s10, 8192, %s547_s7, [#allocation18], %s3620_s29, %s3620_s29, %s3619_s11  }
  0xcb   : > { %s1964_s30 = sadd.s32 4294967294, %s2956_s23   ;;  %s49_s28 = sadd.s32 1, %s2952_s22 }
  0xcc   : > { %s61_s26 = sadd.s32 1, %s2944_s20  ;;  %p50_p7 = scmp.ge.s32.totalorder %s49_s28, 8 }
  0xcd   : > { %p68_p6 = scmp.ne.s32.totalorder %s2944_s20, %s2940_s19  ;;  %p69_p8 = scmp.eq.s32.totalorder %s2956_s23, 0 }
  0xce   : > { %p74_p9 = scmp.ne.s32.totalorder %s2940_s19, %s2936_s18  ;;  %s3671_s28 = smov (%p50_p7, %s49_s28), 0 }
  0xcf   : > { %p3271_p1 = por %p69_p8, %p68_p6  ;;  %p3622_p3 = scmp.eq.s32.totalorder %s3089_s24, 0 }
  0xd0   : > { %s56_s11 = ssub.s32 %s2952_s22, %s3671_s28  ;;  %p3597_p10 = scmp.eq.s32.totalorder %s3089_s24, 7 }
  0xd1   : > { %p3277_p5 = por %p3622_p3, %p74_p9  ;;  %p59_p11 = scmp.eq.s32.totalorder %s56_s11, 0 }
  0xd2   : > { %p359_p12 = scmp.eq.s32.totalorder %s1964_s30, 7  ;;  %p3286_p13 = por %p3597_p10, %p68_p6 }
  0xd3   : > { %s3623_s7 = scalar_select %p3277_p5, 1, 0 }
  0xd4   : > { %s3624_s29 = scalar_select %p3286_p13, 1, 0 }
  0xd5   : > { %p2392_p0 = scmp.lt.s32.totalorder %s2956_s23, 8  ;;  %p3294_p2 = por %p359_p12, %p74_p9 }
  0xd6   : > { %s3292_s3 = scalar_select %p59_p11, %s2944_s20, %s61_s26  }
  0xd7   : > { %s3625_s17 = scalar_select %p3294_p2, 1, 0 }
  0xd8   : > { %s3299_s21 = sand.u32 1, %s2944_s20   ;;  %s2010_s4 = sshll.u32 %s2952_s22, 9 }
  0xd9   : > { %s1975_s25 = sshll.u32 %s3299_s21, 5  ;;  %s3626_s0 = sld [smem:[#allocation37_spill]] }
  0xda   : > { %s567_s16 = scalar_lea.vmem [#allocation5], %s1975_s25  ;;  %p3312_p4 = pnand %p2392_p0, %p3271_p1 }
  0xdb   : > { %s577_s27 = sshll.u32 %s567_s16, 4  ;;  %s1978_s26 = sshll.u32 %s3299_s21, 3  ;;  %s3308_s27 = int_to_ptr.vmem [resolvable:$true] %s577_s27 }
  0xdc   : > { %s564_s11 = scalar_lea.sflag [#allocation6], %s3299_s21  ;;  %p2710_p6 = pneg %p3312_p4 }
  0xdf   : > { %s3306_s15 = scalar_lea.hbm %s3626_s0, %s2010_s4  ;;  %s2713_s2 = scalar_lea.hbm %s3626_s0, 4096 }
  0xe0   : > { %s2708_s4 = scalar_lea.hbm %s3306_s15, 512  ;;  %p2714_p1 = scmp.lt.u32.totalorder %s3306_s15, %s3626_s0 }
  0xe1   : > { %p2709_p7 = scmp.ne.s32.totalorder %s3306_s15, %s2708_s4  ;;  %p2715_p3 = scmp.lt.u32.totalorder %s2713_s2, %s2708_s4 }
  0xe2   : > { %p2717_p12 = scmp.lt.u32.totalorder %s2708_s4, %s3306_s15 }
  0xe3   : > { %p2711_p8 = pnand %p2710_p6, %p2709_p7  ;;  %p2716_p11 = por %p2715_p3, %p2714_p1 }
  0xe5   : > { %p2712_p9 = pneg %p2711_p8  ;;  %p2718_p0 = por %p2717_p12, %p2716_p11 }
  0xe7   : > { %p2719_p10 = pnand %p2718_p0, %p2712_p9 }
  0xe9   : > { %2722 = shalt.err (!%p2719_p10)
}
  0xea   : > { %s2723_s30 = scalar_lea.vmem %s3308_s27, 512  ;;  %s2971_s25 = smov [#allocation5]  }
  0xeb   : > { %p2724_p7 = scmp.ne.s32.totalorder %s3308_s27, %s2723_s30  ;;  %s2728_s12 = sshll.u32 %s2971_s25, 4  ;;  %s2729_s12 = int_to_ptr.vmem [resolvable:$false] %s2728_s12 }
  0xec   : > { %s2730_s13 = scalar_lea.vmem %s2729_s12, 1024  ;;  %p2731_p13 = scmp.lt.s32.totalorder %s3308_s27, %s2729_s12 }
  0xed   : > { %p2726_p8 = pnand %p2724_p7, %p2710_p6  ;;  %p2732_p1 = scmp.lt.s32.totalorder %s2730_s13, %s2723_s30 }
  0xef   : > { %p2727_p2 = pneg %p2726_p8  ;;  %p2733_p3 = por %p2732_p1, %p2731_p13 }
  0xf1   : > { %p2734_p11 = pnand %p2733_p3, %p2727_p2 }
  0xf3   : > { %2737 = shalt.err (!%p2734_p11)
}
  0xf4   : > { %2377 = dma.hbm_to_vmem [thread:$0]  (!%p3312_p4), %s3306_s15, 512, %s3308_s27, %s564_s11  }
  0xf5   : > { %s1979_s4 = sshll.u32 %s2952_s22, 7  ;;  %s588_s30 = scalar_lea.vmem [#allocation8], %s1978_s26 }
  0xf6   : > { %s3348_s25 = scalar_lea.hbm %s3571_s1, %s1979_s4  ;;  %s596_s12 = sshll.u32 %s588_s30, 4  ;;  %s597_s12 = int_to_ptr.vmem [resolvable:$true] %s596_s12 }
  0xf7   : > { %s3628_s13 = sand.u32 1, %s2956_s23   ;;  %s2738_s5 = scalar_lea.hbm %s3348_s25, 128 }
  0xf8   : > { %s585_s0 = scalar_lea.sflag [#allocation9], %s3628_s13  ;;  %p2739_p10 = scmp.ne.s32.totalorder %s3348_s25, %s2738_s5 }
  0xf9   : > { %s2743_s11 = scalar_lea.hbm %s3571_s1, 1024  ;;  %p2744_p9 = scmp.lt.u32.totalorder %s3348_s25, %s3571_s1 }
  0xfa   : > { %p2741_p13 = pnand %p2739_p10, %p2710_p6  ;;  %p2745_p12 = scmp.lt.u32.totalorder %s2743_s11, %s2738_s5 }
  0xfb   : > { %p2747_p7 = scmp.lt.u32.totalorder %s2738_s5, %s3348_s25 }
  0xfc   : > { %p2742_p2 = pneg %p2741_p13  ;;  %p2746_p0 = por %p2745_p12, %p2744_p9 }
  0xfe   : > { %p2748_p8 = por %p2747_p7, %p2746_p0 }
 0x100   : > { %p2749_p1 = pnand %p2748_p8, %p2742_p2 }
 0x102   : > { %2752 = shalt.err (!%p2749_p1)
}
 0x103   : > { %s2753_s26 = scalar_lea.vmem %s597_s12, 128  ;;  %s2972_s2 = smov [#allocation8]  }
 0x104   : > { %p2754_p3 = scmp.ne.s32.totalorder %s597_s12, %s2753_s26  ;;  %s2758_s16 = sshll.u32 %s2972_s2, 4  ;;  %s2759_s16 = int_to_ptr.vmem [resolvable:$false] %s2758_s16 }
 0x105   : > { %s2760_s30 = scalar_lea.vmem %s2759_s16, 256  ;;  %p2761_p13 = scmp.lt.s32.totalorder %s597_s12, %s2759_s16 }
 0x106   : > { %p2756_p11 = pnand %p2754_p3, %p2710_p6  ;;  %p2762_p5 = scmp.lt.s32.totalorder %s2760_s30, %s2753_s26 }
 0x108   : > { %p2757_p10 = pneg %p2756_p11  ;;  %p2763_p9 = por %p2762_p5, %p2761_p13 }
 0x10a   : > { %p2764_p12 = pnand %p2763_p9, %p2757_p10 }
 0x10c   : > { %2767 = shalt.err (!%p2764_p12)
}
 0x10d   : > { %2380 = dma.hbm_to_vmem [thread:$0]  (!%p3312_p4), %s3348_s25, 128, %s597_s12, %s585_s0  }
 0x10e   : > { %s3629_s5 = sld [smem:[#allocation36_spill]] }
 0x114   : > { %p3630_p2 = scmp.ne.s32.totalorder %s3629_s5, 0 }
 0x115   : > { %s3376_s13 = sand.u32 (!%p3630_p2), 1, %s2940_s19   ;;  %p3631_p5 = scmp.ne.s32.totalorder (!%p3630_p2), %s3623_s7, 0 }
 0x116   : > { %605 = sbr.rel (%p3630_p2) target bundleno = 1266 (0x4f2), region = 68  ;;  %s1981_s15 = sshll.u32 (!%p3630_p2), %s3376_s13, 5 }
 0x117   : > { %s608_s27 = scalar_lea.sflag (!%p3630_p2), [#allocation6], %s3376_s13  ;;  %s3380_s11 = scalar_lea.vmem (!%p3630_p2), [#allocation5], %s1981_s15 }
 0x11d   : > { %2899 = dma.done.wait (%p3631_p5), %s608_s27, 512  }
 0x11e   : > { %2901 = vsyncadd (%p3631_p5), %s608_s27, 4294966784  ;;  %s616_s0 = sand.u32 1, %s3089_s24   ;;  %s1982_s14 = sshll.u32 %s3376_s13, 3 }
 0x11f   : > { %s617_s25 = scalar_lea.sflag [#allocation9], %s616_s0  ;;  %s3388_s12 = scalar_lea.vmem [#allocation8], %s1982_s14 }
 0x120   : > { %2903 = dma.done.wait (%p3631_p5), %s617_s25, 128  }
 0x121   : > { %2905 = vsyncadd (%p3631_p5), %s617_s25, 4294967168  ;;  %p3632_p4 = scmp.eq.s32.totalorder %s3089_s24, 0 }
 0x123   : > { %2907 = dma.done.wait (%p3632_p4), [#allocation9], 256   ;;  %p3633_p6 = pmov %p3632_p4 }
 0x124   : > { %p3634_p0 = pmov %p3632_p4 }
 0x125   : > { %2909 = vsyncadd (%p3633_p6), [#allocation9], 4294967040 }
 0x126   : > { %2911 = dma.done.wait (%p3634_p0), [#allocation12], 4352   ;;  %p3635_p7 = pmov %p3634_p0 }
 0x127   : > { %p3636_p8 = pmov %p3634_p0 }
 0x128   : > { %2913 = vsyncadd (%p3635_p7), [#allocation12], 4294962944 }
 0x129   : > { %2915 = dma.done.wait (%p3636_p8), [#allocation15], 12288   ;;  %p3637_p1 = pmov %p3634_p0 }
 0x12a   : > { %p3638_p3 = pmov %p3634_p0 }
 0x12b   : > { %2917 = vsyncadd (%p3637_p1), [#allocation15], 4294955008 }
 0x12c   : > { %2919 = dma.done.wait (%p3638_p3), [#allocation18], 16384   ;;  %p3639_p11 = pmov %p3634_p0 }
 0x12d   : > { %s3410_s7 = scalar_lea.vmem [#allocation20], %s1982_s14  ;;  %s3640_s21 = sld [smem:[#allocation35_spill]] }
 0x12e   : > { %2921 = vsyncadd (%p3639_p11), [#allocation18], 4294950912 }
 0x133   : > { %p1991_p10 = scmp.ne.s32.totalorder %s3640_s21, 0 }
 0x134   : > { %v712_v0 = vld [vmem:[#allocation10] sm:$0xff] (!%p1991_p10)  ;;  %v713_v1 = vld [vmem:[#allocation10 + $0x8] sm:$0xff] (!%p1991_p10)  ;;  %v716_v2 = vld [vmem:[#allocation11] sm:$0xff] (!%p1991_p10)  ;;  %s3641_s2 = sld [smem:[#allocation40_spill]] (!%p1991_p10) }
 0x135   : > { %711 = sbr.rel (%p1991_p10) target bundleno = 316 (0x13c), region = 108  ;;  %714 = vst [vmem:[#allocation2] sm:$0xff] (!%p1991_p10), %v712_v0  ;;  %715 = vst [vmem:[#allocation2 + $0x8] sm:$0xff] (!%p1991_p10), %v713_v1  ;;  %v717_v3 = vld [vmem:[#allocation11 + $0x8] sm:$0xff] (!%p1991_p10) }
 0x136   : > { %718 = vst [vmem:[#allocation3] sm:$0xff] (!%p1991_p10), %v716_v2  ;;  %719 = vst [vmem:[#allocation3 + $0x8] sm:$0xff] (!%p1991_p10), %v717_v3 }
 0x13a   : > { %v720_v4 = vld [vmem:[%s3641_s2] sm:$0xff] (!%p1991_p10) }
 0x13b   : > { %721 = vst [vmem:[#allocation4] sm:$0xff] (!%p1991_p10), %v720_v4 }
 0x13c PF: > { %v741_v5 = vld [vmem:[#allocation13 + $0x80] sm:$0xff]  ;;  %v742_v6 = vld [vmem:[#allocation13 + $0x88] sm:$0xff]  ;;  %v743_v10 = vld [vmem:[#allocation13 + $0x90] sm:$0xff]  ;;  %s3642_s5 = sld [smem:[#allocation42_spill]]  ;;  %s3644_s0 = sld [smem:[#allocation35_spill]] }
 0x13d   : > { %v725_v7 = vld [vmem:[#allocation13] sm:$0xff]  ;;  %v2046_v8 = vpack.c.bf16 %v742_v6, %v741_v5  ;;  %v726_v9 = vld [vmem:[#allocation13 + $0x8] sm:$0xff]  ;;  %v744_v11 = vld [vmem:[#allocation13 + $0x98] sm:$0xff] }
 0x13e   : > { %v2048_v12 = vpack.c.bf16 %v726_v9, %v725_v7  ;;  %v2050_v13 = vpack.c.bf16 %v744_v11, %v743_v10  ;;  %v727_v14 = vld [vmem:[#allocation13 + $0x10] sm:$0xff]  ;;  %v728_v15 = vld [vmem:[#allocation13 + $0x18] sm:$0xff]  ;;  %v745_v16 = vld [vmem:[#allocation13 + $0xa0] sm:$0xff] }
 0x13f   : > { %2047 = vmatprep.subr.bf16.mxu0 %v2046_v8  ;;  %v746_v17 = vld [vmem:[#allocation13 + $0xa8] sm:$0xff]  ;;  %v2052_v18 = vpack.c.bf16 %v728_v15, %v727_v14  ;;  %v729_v20 = vld [vmem:[#allocation13 + $0x20] sm:$0xff]  ;;  %v747_v22 = vld [vmem:[#allocation13 + $0xb0] sm:$0xff] }
 0x140   : > { %2049 = vmatpush3.bf16.msra.mxu0 %v2048_v12  ;;  %v2054_v19 = vpack.c.bf16 %v746_v17, %v745_v16  ;;  %v730_v21 = vld [vmem:[#allocation13 + $0x28] sm:$0xff]  ;;  %v748_v23 = vld [vmem:[#allocation13 + $0xb8] sm:$0xff]  ;;  %v731_v26 = vld [vmem:[#allocation13 + $0x30] sm:$0xff] }
 0x141   : > { %2051 = vmatprep.subr.bf16.mxu0 %v2050_v13  ;;  %v2056_v24 = vpack.c.bf16 %v730_v21, %v729_v20  ;;  %v2058_v25 = vpack.c.bf16 %v748_v23, %v747_v22  ;;  %v732_v27 = vld [vmem:[#allocation13 + $0x38] sm:$0xff]  ;;  %v749_v28 = vld [vmem:[#allocation13 + $0xc0] sm:$0xff]  ;;  %v750_v29 = vld [vmem:[#allocation13 + $0xc8] sm:$0xff] }
 0x142   : > { %v3416_v30 = vld [vmem:[#allocation2 + $0x8] sm:$0xff]  ;;  %v2060_v31 = vpack.c.bf16 %v732_v27, %v731_v26  ;;  %v2062_v32 = vpack.c.bf16 %v750_v29, %v749_v28  ;;  %v733_v33 = vld [vmem:[#allocation13 + $0x40] sm:$0xff]  ;;  %v734_v34 = vld [vmem:[#allocation13 + $0x48] sm:$0xff]  ;;  %p1999_p13 = scmp.ne.s32.totalorder %s3644_s0, 7 }
 0x143   : > { %821 = vmatprep.mubr.f32.mxu0 %v3416_v30  ;;  %v751_v35 = vld [vmem:[#allocation13 + $0xd0] sm:$0xff]  ;;  %v752_v36 = vld [vmem:[#allocation13 + $0xd8] sm:$0xff]  ;;  %v2064_v37 = vpack.c.bf16 %v734_v34, %v733_v33  ;;  %v753_v41 = vld [vmem:[#allocation13 + $0xe0] sm:$0xff] }
 0x144   : > { %2053 = vmatpush3.bf16.msra.mxu0 %v2052_v18  ;;  %v2066_v38 = vpack.c.bf16 %v752_v36, %v751_v35  ;;  %v735_v39 = vld [vmem:[#allocation13 + $0x50] sm:$0xff]  ;;  %v736_v40 = vld [vmem:[#allocation13 + $0x58] sm:$0xff]  ;;  %v754_v42 = vld [vmem:[#allocation13 + $0xe8] sm:$0xff] }
 0x145   : > { %2055 = vmatprep.subr.bf16.mxu0 %v2054_v19  ;;  %v2068_v43 = vpack.c.bf16 %v736_v40, %v735_v39  ;;  %v2070_v44 = vpack.c.bf16 %v754_v42, %v753_v41  ;;  %v737_v45 = vld [vmem:[#allocation13 + $0x60] sm:$0xff]  ;;  %v738_v46 = vld [vmem:[#allocation13 + $0x68] sm:$0xff]  ;;  %v755_v47 = vld [vmem:[#allocation13 + $0xf0] sm:$0xff] }
 0x146   : > { %v756_v48 = vld [vmem:[#allocation13 + $0xf8] sm:$0xff]  ;;  %v2072_v49 = vpack.c.bf16 %v738_v46, %v737_v45  ;;  %v739_v51 = vld [vmem:[#allocation13 + $0x70] sm:$0xff]  ;;  %v3419_v54 = vld [vmem:[#allocation2] sm:$0xff] }
 0x147   : > { %v2074_v50 = vpack.c.bf16 %v756_v48, %v755_v47  ;;  %v740_v52 = vld [vmem:[#allocation13 + $0x78] sm:$0xff]  ;;  %v839_v55 = vld [vmem:[#allocation14 + $0x8] sm:$0xff]  ;;  %v838_v58 = vld [vmem:[#allocation14] sm:$0xff] }
 0x148   : > { %2057 = vmatpush3.bf16.msra.mxu0 %v2056_v24  ;;  %v2076_v53 = vpack.c.bf16 %v740_v52, %v739_v51  ;;  %v841_v56 = vld [vmem:[#allocation14 + $0x18] sm:$0xff]  ;;  %v840_v59 = vld [vmem:[#allocation14 + $0x10] sm:$0xff]  ;;  %v843_v61 = vld [vmem:[#allocation14 + $0x28] sm:$0xff]  ;;  %v2973_v52 = vmov 0.0  }
 0x149   : > { %2059 = vmatprep.subr.bf16.mxu0 %v2058_v25  ;;  %v2078_v57 = vpack.c.bf16 %v841_v56, %v839_v55  ;;  %v2080_v60 = vpack.c.bf16 %v840_v59, %v838_v58  ;;  %v845_v62 = vld [vmem:[#allocation14 + $0x38] sm:$0xff]  ;;  %v842_v0 = vld [vmem:[#allocation14 + $0x20] sm:$0xff]  ;;  %v844_v1 = vld [vmem:[#allocation14 + $0x30] sm:$0xff]  ;;  %946 = vmatprep.mubr.f32.mxu1 %v2973_v52 }
 0x14a   : > { %v2082_v63 = vpack.c.bf16 %v845_v62, %v843_v61  ;;  %v2084_v2 = vpack.c.bf16 %v844_v1, %v842_v0  ;;  %v847_v3 = vld [vmem:[#allocation14 + $0x48] sm:$0xff]  ;;  %v849_v4 = vld [vmem:[#allocation14 + $0x58] sm:$0xff]  ;;  %v846_v6 = vld [vmem:[#allocation14 + $0x40] sm:$0xff] }
 0x14b   : > { %2079 = vmatprep.subr.bf16.mxu1 %v2078_v57  ;;  %v2086_v5 = vpack.c.bf16 %v849_v4, %v847_v3  ;;  %v848_v7 = vld [vmem:[#allocation14 + $0x50] sm:$0xff]  ;;  %v851_v9 = vld [vmem:[#allocation14 + $0x68] sm:$0xff]  ;;  %v853_v10 = vld [vmem:[#allocation14 + $0x78] sm:$0xff] }
 0x14c   : > { %2061 = vmatpush3.bf16.msra.mxu0 %v2060_v31  ;;  %2081 = vmatpush1.bf16.msra.mxu1 %v2080_v60  ;;  %v2088_v8 = vpack.c.bf16 %v848_v7, %v846_v6  ;;  %v2090_v11 = vpack.c.bf16 %v853_v10, %v851_v9  ;;  %v850_v12 = vld [vmem:[#allocation14 + $0x60] sm:$0xff]  ;;  %v852_v13 = vld [vmem:[#allocation14 + $0x70] sm:$0xff]  ;;  %v855_v15 = vld [vmem:[#allocation14 + $0x88] sm:$0xff] }
 0x14d   : > { %2063 = vmatprep.subr.bf16.mxu0 %v2062_v32  ;;  %2083 = vmatprep.subr.bf16.mxu1 %v2082_v63  ;;  %v2092_v14 = vpack.c.bf16 %v852_v13, %v850_v12  ;;  %v857_v16 = vld [vmem:[#allocation14 + $0x98] sm:$0xff]  ;;  %v957_v17 = vld [vmem:[#allocation16 + $0x8] sm:$0xff]  ;;  %v854_v20 = vld [vmem:[#allocation14 + $0x80] sm:$0xff] }
 0x14e   : > { %v2094_v18 = vpack.c.bf16 %v857_v16, %v855_v15  ;;  %v961_v19 = vld [vmem:[#allocation16 + $0x28] sm:$0xff]  ;;  %v856_v21 = vld [vmem:[#allocation14 + $0x90] sm:$0xff]  ;;  %v956_v24 = vld [vmem:[#allocation16] sm:$0xff] }
 0x14f   : > { %v2110_v22 = vpack.c.bf16 %v961_v19, %v957_v17  ;;  %v2096_v23 = vpack.c.bf16 %v856_v21, %v854_v20  ;;  %v960_v25 = vld [vmem:[#allocation16 + $0x20] sm:$0xff]  ;;  %v859_v27 = vld [vmem:[#allocation14 + $0xa8] sm:$0xff]  ;;  %v861_v28 = vld [vmem:[#allocation14 + $0xb8] sm:$0xff] }
 0x150   : > { %2065 = vmatpush3.bf16.msra.mxu0 %v2064_v37  ;;  %2085 = vmatpush1.bf16.msra.mxu1 %v2084_v2  ;;  %v2112_v26 = vpack.c.bf16 %v960_v25, %v956_v24  ;;  %v965_v29 = vld [vmem:[#allocation16 + $0x48] sm:$0xff]  ;;  %v2098_v31 = vpack.c.bf16 %v861_v28, %v859_v27  ;;  %v858_v33 = vld [vmem:[#allocation14 + $0xa0] sm:$0xff]  ;;  %v860_v34 = vld [vmem:[#allocation14 + $0xb0] sm:$0xff] }
 0x151   : > { %2067 = vmatprep.subr.bf16.mxu0 %v2066_v38  ;;  %2087 = vmatprep.subr.bf16.mxu1 %v2086_v5  ;;  %v969_v32 = vld [vmem:[#allocation16 + $0x68] sm:$0xff]  ;;  %v2100_v36 = vpack.c.bf16 %v860_v34, %v858_v33  ;;  %v964_v37 = vld [vmem:[#allocation16 + $0x40] sm:$0xff]  ;;  %v865_v41 = vld [vmem:[#allocation14 + $0xd8] sm:$0xff] }
 0x152   : > { %v2114_v35 = vpack.c.bf16 %v969_v32, %v965_v29  ;;  %v968_v38 = vld [vmem:[#allocation16 + $0x60] sm:$0xff]  ;;  %v863_v40 = vld [vmem:[#allocation14 + $0xc8] sm:$0xff]  ;;  %v864_v46 = vld [vmem:[#allocation14 + $0xd0] sm:$0xff] }
 0x153   : > { %v2116_v39 = vpack.c.bf16 %v968_v38, %v964_v37  ;;  %v973_v42 = vld [vmem:[#allocation16 + $0x88] sm:$0xff]  ;;  %v862_v45 = vld [vmem:[#allocation14 + $0xc0] sm:$0xff]  ;;  %v869_v55 = vld [vmem:[#allocation14 + $0xf8] sm:$0xff] }
 0x154   : > { %2069 = vmatpush3.bf16.msra.mxu0 %v2068_v43  ;;  %2089 = vmatpush1.bf16.msra.mxu1 %v2088_v8  ;;  %v2102_v43 = vpack.c.bf16 %v865_v41, %v863_v40  ;;  %v2104_v48 = vpack.c.bf16 %v864_v46, %v862_v45  ;;  %v867_v51 = vld [vmem:[#allocation14 + $0xe8] sm:$0xff]  ;;  %v866_v60 = vld [vmem:[#allocation14 + $0xe0] sm:$0xff]  ;;  %v868_v61 = vld [vmem:[#allocation14 + $0xf0] sm:$0xff] }
 0x155   : > { %2071 = vmatprep.subr.bf16.mxu0 %v2070_v44  ;;  %2091 = vmatprep.subr.bf16.mxu1 %v2090_v11  ;;  %v977_v44 = vld [vmem:[#allocation16 + $0xa8] sm:$0xff]  ;;  %v2106_v58 = vpack.c.bf16 %v869_v55, %v867_v51  ;;  %v980_v62 = vld [vmem:[#allocation16 + $0xc0] sm:$0xff]  ;;  %v2108_v63 = vpack.c.bf16 %v868_v61, %v866_v60  ;;  %v959_v4 = vld [vmem:[#allocation16 + $0x18] sm:$0xff] }
 0x156   : > { %v2118_v47 = vpack.c.bf16 %v977_v44, %v973_v42  ;;  %v981_v56 = vld [vmem:[#allocation16 + $0xc8] sm:$0xff]  ;;  %v984_v0 = vld [vmem:[#allocation16 + $0xe0] sm:$0xff]  ;;  %v963_v5 = vld [vmem:[#allocation16 + $0x38] sm:$0xff] }
 0x157   : > { %v985_v57 = vld [vmem:[#allocation16 + $0xe8] sm:$0xff]  ;;  %v2124_v3 = vpack.c.bf16 %v984_v0, %v980_v62  ;;  %v2142_v7 = vpack.c.bf16 %v963_v5, %v959_v4  ;;  %v988_v8 = vld [vmem:[#allocation16 + $0x100] sm:$0xff]  ;;  %v827_v33 = vld [vmem:[%s3388_s12] sm:$0xff] }
 0x158   : > { %2073 = vmatpush3.bf16.msra.mxu0 %v2072_v49  ;;  %2093 = vmatpush1.bf16.msra.mxu1 %v2092_v14  ;;  %v972_v49 = vld [vmem:[#allocation16 + $0x80] sm:$0xff]  ;;  %v2122_v59 = vpack.c.bf16 %v985_v57, %v981_v56  ;;  %v989_v1 = vld [vmem:[#allocation16 + $0x108] sm:$0xff]  ;;  %v962_v40 = vld [vmem:[#allocation16 + $0x30] sm:$0xff] }
 0x159   : > { %2075 = vmatprep.subr.bf16.mxu0 %v2074_v50  ;;  %2095 = vmatprep.subr.bf16.mxu1 %v2094_v18  ;;  %v976_v50 = vld [vmem:[#allocation16 + $0xa0] sm:$0xff]  ;;  %v993_v2 = vld [vmem:[#allocation16 + $0x128] sm:$0xff]  ;;  %v967_v42 = vld [vmem:[#allocation16 + $0x58] sm:$0xff] }
 0x15a   : > { %v2126_v6 = vpack.c.bf16 %v993_v2, %v989_v1  ;;  %v992_v9 = vld [vmem:[#allocation16 + $0x120] sm:$0xff]  ;;  %v997_v11 = vld [vmem:[#allocation16 + $0x148] sm:$0xff]  ;;  %v979_v51 = vld [vmem:[#allocation16 + $0xb8] sm:$0xff] }
 0x15b   : > { %v2128_v10 = vpack.c.bf16 %v992_v9, %v988_v8  ;;  %v1001_v12 = vld [vmem:[#allocation16 + $0x168] sm:$0xff]  ;;  %v996_v14 = vld [vmem:[#allocation16 + $0x140] sm:$0xff]  ;;  %v974_v56 = vld [vmem:[#allocation16 + $0x90] sm:$0xff] }
 0x15c   : > { %2077 = vmatpush3.bf16.msra.mxu0 %v2076_v53  ;;  %2097 = vmatpush1.bf16.msra.mxu1 %v2096_v23  ;;  %v2120_v53 = vpack.c.bf16 %v976_v50, %v972_v49  ;;  %v2130_v13 = vpack.c.bf16 %v1001_v12, %v997_v11  ;;  %v1000_v15 = vld [vmem:[#allocation16 + $0x160] sm:$0xff]  ;;  %v1005_v17 = vld [vmem:[#allocation16 + $0x188] sm:$0xff]  ;;  %v970_v49 = vld [vmem:[#allocation16 + $0x70] sm:$0xff] }
 0x15d   : > { %2111 = vmatprep.subr.bf16.mxu0 %v2110_v22  ;;  %2099 = vmatprep.subr.bf16.mxu1 %v2098_v31  ;;  %v2132_v16 = vpack.c.bf16 %v1000_v15, %v996_v14  ;;  %v1009_v18 = vld [vmem:[#allocation16 + $0x1a8] sm:$0xff]  ;;  %v1004_v20 = vld [vmem:[#allocation16 + $0x180] sm:$0xff]  ;;  %v975_v50 = vld [vmem:[#allocation16 + $0x98] sm:$0xff] }
 0x15e   : > { %v2134_v19 = vpack.c.bf16 %v1009_v18, %v1005_v17  ;;  %v1008_v21 = vld [vmem:[#allocation16 + $0x1a0] sm:$0xff]  ;;  %v1013_v23 = vld [vmem:[#allocation16 + $0x1c8] sm:$0xff]  ;;  %v2150_v55 = vpack.c.bf16 %v979_v51, %v975_v50  ;;  %v978_v57 = vld [vmem:[#allocation16 + $0xb0] sm:$0xff] }
 0x15f   : > { %822 = vmatmul.mubr.f32.vlgmr.msra.gmra.mrb[0].mxu0 %v3419_v54  ;;  %v2136_v22 = vpack.c.bf16 %v1008_v21, %v1004_v20  ;;  %v1017_v24 = vld [vmem:[#allocation16 + $0x1e8] sm:$0xff]  ;;  %v1016_v27 = vld [vmem:[#allocation16 + $0x1e0] sm:$0xff]  ;;  %v2152_v60 = vpack.c.bf16 %v978_v57, %v974_v56  ;;  %v982_v62 = vld [vmem:[#allocation16 + $0xd0] sm:$0xff] }
 0x160   : > { %2113 = vmatpush1.bf16.msra.mxu0 %v2112_v26  ;;  %2101 = vmatpush1.bf16.msra.mxu1 %v2100_v36  ;;  %v2138_v25 = vpack.c.bf16 %v1017_v24, %v1013_v23  ;;  %v1012_v26 = vld [vmem:[#allocation16 + $0x1c0] sm:$0xff]  ;;  %v724_v41 = vld [vmem:[#allocation4] sm:$0xff]  ;;  %v991_v0 = vld [vmem:[#allocation16 + $0x118] sm:$0xff] }
 0x161   : > { %2115 = vmatprep.subr.bf16.mxu0 %v2114_v35  ;;  %2103 = vmatprep.subr.bf16.mxu1 %v2102_v43  ;;  %v2140_v28 = vpack.c.bf16 %v1016_v27, %v1012_v26  ;;  %v971_v43 = vld [vmem:[#allocation16 + $0x78] sm:$0xff]  ;;  %v990_v4 = vld [vmem:[#allocation16 + $0x110] sm:$0xff]  ;;  %v1203_v26 = vld [vmem:[#allocation17 + $0x28] sm:$0xff] }
 0x162   : > { %1084 = vmatprep.mubr.f32.mxu0 %v2973_v52  ;;  %v995_v1 = vld [vmem:[#allocation16 + $0x138] sm:$0xff]  ;;  %v994_v5 = vld [vmem:[#allocation16 + $0x130] sm:$0xff]  ;;  %v1219_v50 = vld [vmem:[#allocation17 + $0xa8] sm:$0xff] }
 0x163   : > { %v2160_v8 = vpack.c.bf16 %v994_v5, %v990_v4  ;;  %v1002_v11 = vld [vmem:[#allocation16 + $0x170] sm:$0xff]  ;;  %v1007_v12 = vld [vmem:[#allocation16 + $0x198] sm:$0xff]  ;;  %v1214_v57 = vld [vmem:[#allocation17 + $0x80] sm:$0xff] }
 0x164   : > { %2117 = vmatpush1.bf16.msra.mxu0 %v2116_v39  ;;  %2105 = vmatpush1.bf16.msra.mxu1 %v2104_v48  ;;  %v958_v39 = vld [vmem:[#allocation16 + $0x10] sm:$0xff]  ;;  %v1015_v18 = vld [vmem:[#allocation16 + $0x1d8] sm:$0xff]  ;;  %v1222_v4 = vld [vmem:[#allocation17 + $0xc0] sm:$0xff] }
 0x165   : > { %2119 = vmatprep.subr.bf16.mxu0 %v2118_v47  ;;  %2107 = vmatprep.subr.bf16.mxu1 %v2106_v58  ;;  %v2144_v45 = vpack.c.bf16 %v962_v40, %v958_v39  ;;  %v2146_v47 = vpack.c.bf16 %v971_v43, %v967_v42  ;;  %v966_v48 = vld [vmem:[#allocation16 + $0x50] sm:$0xff]  ;;  %v983_v58 = vld [vmem:[#allocation16 + $0xd8] sm:$0xff]  ;;  %v1211_v39 = vld [vmem:[#allocation17 + $0x68] sm:$0xff] }
 0x166   : > { %v1010_v17 = vld [vmem:[#allocation16 + $0x1b0] sm:$0xff]  ;;  %v1201_v27 = vld [vmem:[#allocation17 + $0x18] sm:$0xff]  ;;  %v1206_v42 = vld [vmem:[#allocation17 + $0x40] sm:$0xff] }
 0x167   : > { %v1018_v23 = vld [vmem:[#allocation16 + $0x1f0] sm:$0xff]  ;;  %v1210_v43 = vld [vmem:[#allocation17 + $0x60] sm:$0xff]  ;;  %v1217_v51 = vld [vmem:[#allocation17 + $0x98] sm:$0xff] }
 0x168   : > { %2121 = vmatpush1.bf16.msra.mxu0 %v2120_v53  ;;  %2109 = vmatpush1.bf16.msra.mxu1 %v2108_v63  ;;  %v2148_v53 = vpack.c.bf16 %v970_v49, %v966_v48  ;;  %v986_v63 = vld [vmem:[#allocation16 + $0xf0] sm:$0xff]  ;;  %v1215_v48 = vld [vmem:[#allocation17 + $0x88] sm:$0xff] }
 0x169   : > { %2123 = vmatprep.subr.bf16.mxu0 %v2122_v59  ;;  %2143 = vmatprep.subr.bf16.mxu1 %v2142_v7  ;;  %v987_v59 = vld [vmem:[#allocation16 + $0xf8] sm:$0xff]  ;;  %v2156_v2 = vpack.c.bf16 %v986_v63, %v982_v62  ;;  %v1223_v62 = vld [vmem:[#allocation17 + $0xc8] sm:$0xff] }
 0x16a   : > { %v2154_v61 = vpack.c.bf16 %v987_v59, %v983_v58  ;;  %v1003_v7 = vld [vmem:[#allocation16 + $0x178] sm:$0xff]  ;;  %v1218_v58 = vld [vmem:[#allocation17 + $0xa0] sm:$0xff]  ;;  %v1216_v59 = vld [vmem:[#allocation17 + $0x90] sm:$0xff] }
 0x16b   : > { %v1227_v63 = vld [vmem:[#allocation17 + $0xe8] sm:$0xff] }
 0x16c   : > { %2125 = vmatpush1.bf16.msra.mxu0 %v2124_v3  ;;  %v2158_v3 = vpack.c.bf16 %v995_v1, %v991_v0  ;;  %v2186_v1 = vpack.c.bf16 %v1227_v63, %v1223_v62  ;;  %v1405_v63 = vld [vmem:[#allocation19 + $0x8] sm:$0xff] }
 0x16d   : > { %2127 = vmatprep.subr.bf16.mxu0 %v2126_v6  ;;  %v999_v6 = vld [vmem:[#allocation16 + $0x158] sm:$0xff] }
 0x16e   : > { %v2162_v9 = vpack.c.bf16 %v1003_v7, %v999_v6  ;;  %v1226_v6 = vld [vmem:[#allocation17 + $0xe0] sm:$0xff]  ;;  %v1224_v7 = vld [vmem:[#allocation17 + $0xd0] sm:$0xff] }
 0x170   : > { %2129 = vmatpush1.bf16.msra.mxu0 %v2128_v10  ;;  %v998_v10 = vld [vmem:[#allocation16 + $0x150] sm:$0xff] }
 0x171   : > { %2131 = vmatprep.subr.bf16.mxu0 %v2130_v13  ;;  %v1011_v13 = vld [vmem:[#allocation16 + $0x1b8] sm:$0xff]  ;;  %v2164_v14 = vpack.c.bf16 %v1002_v11, %v998_v10  ;;  %v1231_v11 = vld [vmem:[#allocation17 + $0x108] sm:$0xff] }
 0x172   : > { %v2166_v15 = vpack.c.bf16 %v1011_v13, %v1007_v12  ;;  %v1235_v12 = vld [vmem:[#allocation17 + $0x128] sm:$0xff]  ;;  %v1233_v13 = vld [vmem:[#allocation17 + $0x118] sm:$0xff] }
 0x174   : > { %2133 = vmatpush1.bf16.msra.mxu0 %v2132_v16  ;;  %v1006_v16 = vld [vmem:[#allocation16 + $0x190] sm:$0xff] }
 0x175   : > { %2135 = vmatprep.subr.bf16.mxu0 %v2134_v19  ;;  %v1019_v19 = vld [vmem:[#allocation16 + $0x1f8] sm:$0xff]  ;;  %v2168_v20 = vpack.c.bf16 %v1010_v17, %v1006_v16  ;;  %v1230_v16 = vld [vmem:[#allocation17 + $0x100] sm:$0xff] }
 0x176   : > { %v2170_v21 = vpack.c.bf16 %v1019_v19, %v1015_v18  ;;  %v1234_v17 = vld [vmem:[#allocation17 + $0x120] sm:$0xff]  ;;  %v1232_v19 = vld [vmem:[#allocation17 + $0x110] sm:$0xff] }
 0x178   : > { %2137 = vmatpush1.bf16.msra.mxu0 %v2136_v22  ;;  %v1014_v22 = vld [vmem:[#allocation16 + $0x1d0] sm:$0xff] }
 0x179   : > { %2139 = vmatprep.subr.bf16.mxu0 %v2138_v25  ;;  %v2172_v24 = vpack.c.bf16 %v1018_v23, %v1014_v22  ;;  %v1199_v25 = vld [vmem:[#allocation17 + $0x8] sm:$0xff]  ;;  %v2192_v22 = vpack.c.bf16 %v1234_v17, %v1230_v16  ;;  %v1412_v16 = vld [vmem:[#allocation19 + $0x40] sm:$0xff] }
 0x17a   : > { %v1243_v23 = vld [vmem:[#allocation17 + $0x168] sm:$0xff]  ;;  %v1416_v17 = vld [vmem:[#allocation19 + $0x60] sm:$0xff] }
 0x17c   : > { %2141 = vmatpush1.bf16.msra.mxu0 %v2140_v28  ;;  %v2174_v28 = vpack.c.bf16 %v1203_v26, %v1199_v25  ;;  %v1245_v25 = vld [vmem:[#allocation17 + $0x178] sm:$0xff] }
 0x17e   : > { %2175 = vmatprep.subr.bf16.mxu0 %v2174_v28 }
 0x17f   : > { %1085 = vmatmul.mubr.f32.vlgmr.msra.gmra.mrb[2].mxu0 %v3419_v54 }
 0x180   : > { %1326 = vmatprep.mubr.f32.mxu0 %v2973_v52 }
 0x232   : > { %v2043_v29 = vpop.f32.mrb[0].mxu0 }
 0x233   : > { %v2044_v31 = vpop.f32.mrb[1].mxu0 }
 0x234   : > { %v2045_v32 = vadd.f32 %v2044_v31, %v2043_v29  ;;  %v1205_v29 = vld [vmem:[#allocation17 + $0x38] sm:$0xff]  ;;  %v1198_v31 = vld [vmem:[#allocation17] sm:$0xff] }
 0x236   : > { %v828_v34 = vmul.f32 0.5, %v2045_v32  ;;  %v1202_v32 = vld [vmem:[#allocation17 + $0x20] sm:$0xff] }
 0x238   : > { %v829_v35 = vadd.f32 %v828_v34, %v827_v33  ;;  %v2206_v33 = vpack.c.bf16 %v1205_v29, %v1201_v27  ;;  %v2176_v34 = vpack.c.bf16 %v1202_v32, %v1198_v31  ;;  %v1238_v29 = vld [vmem:[#allocation17 + $0x140] sm:$0xff]  ;;  %v1240_v32 = vld [vmem:[#allocation17 + $0x150] sm:$0xff] }
 0x239   : > { %v1242_v31 = vld [vmem:[#allocation17 + $0x160] sm:$0xff] }
 0x23a   : > { %v1992_v36 = vmul.f32 -1.442695, %v829_v35  ;;  %v1200_v35 = vld [vmem:[#allocation17 + $0x10] sm:$0xff]  ;;  %2177 = vmatpush1.bf16.msra.mxu0 %v2176_v34 }
 0x23c   : > { %2472 = vpow2.f32 %v1992_v36  ;;  %v1204_v36 = vld [vmem:[#allocation17 + $0x30] sm:$0xff] }
 0x246   : > { %v2473_v37 = vpop.eup %2472 }
 0x247   : > { %v833_v38 = vadd.f32 1.0, %v2473_v37  ;;  %v2208_v37 = vpack.c.bf16 %v1204_v36, %v1200_v35  ;;  %v1244_v35 = vld [vmem:[#allocation17 + $0x170] sm:$0xff]  ;;  %v1247_v36 = vld [vmem:[#allocation17 + $0x188] sm:$0xff] }
 0x249   : > { %2474 = vrcp.f32 %v833_v38  ;;  %v1207_v38 = vld [vmem:[#allocation17 + $0x48] sm:$0xff] }
 0x24a   : > { %v2178_v40 = vpack.c.bf16 %v1211_v39, %v1207_v38  ;;  %v1249_v38 = vld [vmem:[#allocation17 + $0x198] sm:$0xff] }
 0x24b   : > { %v1253_v39 = vld [vmem:[#allocation17 + $0x1b8] sm:$0xff] }
 0x24c   : > { %2179 = vmatprep.subr.bf16.mxu0 %v2178_v40  ;;  %v2228_v40 = vpack.c.bf16 %v1244_v35, %v1240_v32  ;;  %v1426_v35 = vld [vmem:[#allocation19 + $0xb0] sm:$0xff] }
 0x252   : > { %v3430_v26 = vpop.f32.mrb[2].mxu0 }
 0x253   : > { %v2475_v44 = vpop.eup %2474 }
 0x254   : > { %v836_v46 = vmul.f32 %v2475_v44, %v724_v41  ;;  %v1213_v41 = vld [vmem:[#allocation17 + $0x78] sm:$0xff] }
 0x256   : > { %837 = vst [vmem:[#allocation4] sm:$0xff] %v836_v46  ;;  %947 = vmatmul.mubr.f32.vlgmr.msra.gmra.mrb[0].mxu1 %v836_v46  ;;  %v1208_v46 = vld [vmem:[#allocation17 + $0x50] sm:$0xff] }
 0x257   : > { %2145 = vmatpush1.bf16.msra.mxu1 %v2144_v45  ;;  %1155 = vmatprep.mubr.f32.mxu1 %v2973_v52  ;;  %v2180_v45 = vpack.c.bf16 %v1210_v43, %v1206_v42  ;;  %v1246_v42 = vld [vmem:[#allocation17 + $0x180] sm:$0xff] }
 0x258   : > { %2147 = vmatprep.subr.bf16.mxu1 %v2146_v47  ;;  %v1212_v47 = vld [vmem:[#allocation17 + $0x70] sm:$0xff]  ;;  %v1250_v43 = vld [vmem:[#allocation17 + $0x1a0] sm:$0xff] }
 0x259   : > { %v2212_v49 = vpack.c.bf16 %v1212_v47, %v1208_v46  ;;  %2181 = vmatpush1.bf16.msra.mxu0 %v2180_v45  ;;  %v2230_v45 = vpack.c.bf16 %v1253_v39, %v1249_v38  ;;  %v1252_v46 = vld [vmem:[#allocation17 + $0x1b0] sm:$0xff]  ;;  %v1255_v47 = vld [vmem:[#allocation17 + $0x1c8] sm:$0xff]  ;;  %v1431_v38 = vld [vmem:[#allocation19 + $0xd8] sm:$0xff] }
 0x25b   : > { %2149 = vmatpush1.bf16.msra.mxu1 %v2148_v53  ;;  %v1221_v53 = vld [vmem:[#allocation17 + $0xb8] sm:$0xff] }
 0x25c   : > { %2151 = vmatprep.subr.bf16.mxu1 %v2150_v55  ;;  %v2182_v55 = vpack.c.bf16 %v1219_v50, %v1215_v48  ;;  %v2214_v56 = vpack.c.bf16 %v1221_v53, %v1217_v51  ;;  %v1259_v48 = vld [vmem:[#allocation17 + $0x1e8] sm:$0xff]  ;;  %v1261_v50 = vld [vmem:[#allocation17 + $0x1f8] sm:$0xff]  ;;  %v2200_v51 = vpack.c.bf16 %v1250_v43, %v1246_v42 }
 0x25e   : > { %2183 = vmatprep.subr.bf16.mxu0 %v2182_v55  ;;  %v2202_v55 = vpack.c.bf16 %v1259_v48, %v1255_v47  ;;  %v1437_v47 = vld [vmem:[#allocation19 + $0x108] sm:$0xff] }
 0x25f   : > { %2153 = vmatpush1.bf16.msra.mxu1 %v2152_v60  ;;  %v2184_v60 = vpack.c.bf16 %v1218_v58, %v1214_v57  ;;  %v1258_v57 = vld [vmem:[#allocation17 + $0x1e0] sm:$0xff]  ;;  %v1441_v48 = vld [vmem:[#allocation19 + $0x128] sm:$0xff] }
 0x260   : > { %2155 = vmatprep.subr.bf16.mxu1 %v2154_v61  ;;  %v1220_v61 = vld [vmem:[#allocation17 + $0xb0] sm:$0xff] }
 0x261   : > { %v2216_v0 = vpack.c.bf16 %v1220_v61, %v1216_v59  ;;  %2185 = vmatpush1.bf16.msra.mxu0 %v2184_v60  ;;  %v1256_v59 = vld [vmem:[#allocation17 + $0x1d0] sm:$0xff] }
 0x262   : > { %2187 = vmatprep.subr.bf16.mxu0 %v2186_v1  ;;  %v1260_v60 = vld [vmem:[#allocation17 + $0x1f0] sm:$0xff]  ;;  %v1407_v1 = vld [vmem:[#allocation19 + $0x18] sm:$0xff] }
 0x263   : > { %2157 = vmatpush1.bf16.msra.mxu1 %v2156_v2  ;;  %v1225_v2 = vld [vmem:[#allocation17 + $0xd8] sm:$0xff]  ;;  %v2236_v62 = vpack.c.bf16 %v1260_v60, %v1256_v59  ;;  %v1442_v59 = vld [vmem:[#allocation19 + $0x130] sm:$0xff] }
 0x264   : > { %2159 = vmatprep.subr.bf16.mxu1 %v2158_v3  ;;  %v1229_v3 = vld [vmem:[#allocation17 + $0xf8] sm:$0xff] }
 0x265   : > { %v2218_v5 = vpack.c.bf16 %v1229_v3, %v1225_v2  ;;  %v1411_v3 = vld [vmem:[#allocation19 + $0x38] sm:$0xff] }
 0x267   : > { %2161 = vmatpush1.bf16.msra.mxu1 %v2160_v8  ;;  %v1228_v8 = vld [vmem:[#allocation17 + $0xf0] sm:$0xff] }
 0x268   : > { %2163 = vmatprep.subr.bf16.mxu1 %v2162_v9  ;;  %v2188_v9 = vpack.c.bf16 %v1226_v6, %v1222_v4  ;;  %v2220_v10 = vpack.c.bf16 %v1228_v8, %v1224_v7  ;;  %v1404_v4 = vld [vmem:[#allocation19] sm:$0xff]  ;;  %v1406_v7 = vld [vmem:[#allocation19 + $0x10] sm:$0xff] }
 0x269   : > { %v1408_v6 = vld [vmem:[#allocation19 + $0x20] sm:$0xff] }
 0x26a   : > { %2189 = vmatpush1.bf16.msra.mxu0 %v2188_v9  ;;  %v2240_v8 = vpack.c.bf16 %v1408_v6, %v1404_v4  ;;  %v1410_v9 = vld [vmem:[#allocation19 + $0x30] sm:$0xff] }
 0x26b   : > { %2165 = vmatpush1.bf16.msra.mxu1 %v2164_v14  ;;  %v2190_v14 = vpack.c.bf16 %v1235_v12, %v1231_v11  ;;  %v1413_v11 = vld [vmem:[#allocation19 + $0x48] sm:$0xff]  ;;  %v1446_v6 = vld [vmem:[#allocation19 + $0x150] sm:$0xff] }
 0x26c   : > { %2167 = vmatprep.subr.bf16.mxu1 %v2166_v15  ;;  %v1237_v15 = vld [vmem:[#allocation17 + $0x138] sm:$0xff]  ;;  %v1417_v12 = vld [vmem:[#allocation19 + $0x68] sm:$0xff] }
 0x26d   : > { %v2222_v18 = vpack.c.bf16 %v1237_v15, %v1233_v13  ;;  %2191 = vmatprep.subr.bf16.mxu0 %v2190_v14  ;;  %v1415_v13 = vld [vmem:[#allocation19 + $0x58] sm:$0xff]  ;;  %v2242_v14 = vpack.c.bf16 %v1417_v12, %v1413_v11 }
 0x26e   : > { %2193 = vmatpush1.bf16.msra.mxu0 %v2192_v22  ;;  %v1419_v15 = vld [vmem:[#allocation19 + $0x78] sm:$0xff]  ;;  %v1421_v22 = vld [vmem:[#allocation19 + $0x88] sm:$0xff] }
 0x26f   : > { %2169 = vmatpush1.bf16.msra.mxu1 %v2168_v20  ;;  %v1236_v20 = vld [vmem:[#allocation17 + $0x130] sm:$0xff]  ;;  %v1455_v11 = vld [vmem:[#allocation19 + $0x198] sm:$0xff] }
 0x270   : > { %2171 = vmatprep.subr.bf16.mxu1 %v2170_v21  ;;  %v1239_v21 = vld [vmem:[#allocation17 + $0x148] sm:$0xff]  ;;  %v2224_v27 = vpack.c.bf16 %v1236_v20, %v1232_v19  ;;  %v2244_v19 = vpack.c.bf16 %v1416_v17, %v1412_v16  ;;  %v1414_v20 = vld [vmem:[#allocation19 + $0x50] sm:$0xff]  ;;  %v1459_v12 = vld [vmem:[#allocation19 + $0x1b8] sm:$0xff] }
 0x271   : > { %v2194_v28 = vpack.c.bf16 %v1243_v23, %v1239_v21  ;;  %v1418_v21 = vld [vmem:[#allocation19 + $0x70] sm:$0xff]  ;;  %v1425_v23 = vld [vmem:[#allocation19 + $0xa8] sm:$0xff]  ;;  %v1456_v16 = vld [vmem:[#allocation19 + $0x1a0] sm:$0xff] }
 0x272   : > { %v1454_v17 = vld [vmem:[#allocation19 + $0x190] sm:$0xff] }
 0x273   : > { %2173 = vmatpush1.bf16.msra.mxu1 %v2172_v24  ;;  %v1241_v24 = vld [vmem:[#allocation17 + $0x158] sm:$0xff]  ;;  %2195 = vmatprep.subr.bf16.mxu0 %v2194_v28  ;;  %v1420_v28 = vld [vmem:[#allocation19 + $0x80] sm:$0xff] }
 0x274   : > { %2207 = vmatprep.subr.bf16.mxu1 %v2206_v33  ;;  %v3432_v33 = vpop.f32.mrb[3].mxu0  ;;  %v2226_v34 = vpack.c.bf16 %v1245_v25, %v1241_v24  ;;  %v1423_v24 = vld [vmem:[#allocation19 + $0x98] sm:$0xff]  ;;  %v2246_v25 = vpack.c.bf16 %v1425_v23, %v1421_v22 }
 0x275   : > { %v1463_v23 = vld [vmem:[#allocation19 + $0x1d8] sm:$0xff] }
 0x276   : > { %1156 = vmatmul.mubr.f32.vlgmr.msra.gmra.mrb[2].mxu1 %v3419_v54  ;;  %v1209_v54 = vld [vmem:[#allocation17 + $0x58] sm:$0xff] }
 0x277   : > { %1397 = vmatprep.mubr.f32.mxu1 %v2973_v52  ;;  %2209 = vmatpush1.bf16.msra.mxu1 %v2208_v37  ;;  %v2210_v44 = vpack.c.bf16 %v1213_v41, %v1209_v54  ;;  %v1251_v37 = vld [vmem:[#allocation17 + $0x1a8] sm:$0xff]  ;;  %v2196_v54 = vpack.c.bf16 %v1242_v31, %v1238_v29  ;;  %v1424_v29 = vld [vmem:[#allocation19 + $0xa0] sm:$0xff] }
 0x278   : > { %v2198_v41 = vpack.c.bf16 %v1251_v37, %v1247_v36  ;;  %v2248_v32 = vpack.c.bf16 %v1424_v29, %v1420_v28  ;;  %v1433_v37 = vld [vmem:[#allocation19 + $0xe8] sm:$0xff]  ;;  %v1464_v28 = vld [vmem:[#allocation19 + $0x1e0] sm:$0xff]  ;;  %v1462_v29 = vld [vmem:[#allocation19 + $0x1d0] sm:$0xff] }
 0x279   : > { %2211 = vmatprep.subr.bf16.mxu1 %v2210_v44  ;;  %v1248_v44 = vld [vmem:[#allocation17 + $0x190] sm:$0xff]  ;;  %2197 = vmatpush1.bf16.msra.mxu0 %v2196_v54  ;;  %v1435_v54 = vld [vmem:[#allocation19 + $0xf8] sm:$0xff] }
 0x27a   : > { %2199 = vmatprep.subr.bf16.mxu0 %v2198_v41  ;;  %v2232_v53 = vpack.c.bf16 %v1252_v46, %v1248_v44  ;;  %v1432_v41 = vld [vmem:[#allocation19 + $0xe0] sm:$0xff]  ;;  %v2282_v42 = vpack.c.bf16 %v1435_v54, %v1431_v38  ;;  %v1430_v44 = vld [vmem:[#allocation19 + $0xd0] sm:$0xff] }
 0x27b   : > { %2213 = vmatpush1.bf16.msra.mxu1 %v2212_v49  ;;  %v1257_v49 = vld [vmem:[#allocation17 + $0x1d8] sm:$0xff] }
 0x27c   : > { %2215 = vmatprep.subr.bf16.mxu1 %v2214_v56  ;;  %v1254_v56 = vld [vmem:[#allocation17 + $0x1c0] sm:$0xff]  ;;  %v2234_v58 = vpack.c.bf16 %v1261_v50, %v1257_v49  ;;  %v1439_v49 = vld [vmem:[#allocation19 + $0x118] sm:$0xff]  ;;  %v2254_v50 = vpack.c.bf16 %v1441_v48, %v1437_v47  ;;  %v870_v47 = vld [vmem:[%s3642_s5] sm:$0x3] }
 0x27d   : > { %2201 = vmatpush1.bf16.msra.mxu0 %v2200_v51  ;;  %v2204_v61 = vpack.c.bf16 %v1258_v57, %v1254_v56  ;;  %v1443_v51 = vld [vmem:[#allocation19 + $0x138] sm:$0xff] }
 0x27e   : > { %2203 = vmatprep.subr.bf16.mxu0 %v2202_v55  ;;  %v1440_v55 = vld [vmem:[#allocation19 + $0x120] sm:$0xff]  ;;  %v2286_v56 = vpack.c.bf16 %v1443_v51, %v1439_v49  ;;  %v1165_v49 = vld [vmem:[%s3380_s11 + $0x18] sm:$0xff] }
 0x27f   : > { %2217 = vmatpush1.bf16.msra.mxu1 %v2216_v0  ;;  %v1409_v0 = vld [vmem:[#allocation19 + $0x28] sm:$0xff] }
 0x280   : > { %2219 = vmatprep.subr.bf16.mxu1 %v2218_v5  ;;  %v2238_v2 = vpack.c.bf16 %v1409_v0, %v1405_v63  ;;  %v2270_v5 = vpack.c.bf16 %v1411_v3, %v1407_v1  ;;  %v1447_v63 = vld [vmem:[#allocation19 + $0x158] sm:$0xff]  ;;  %v1448_v3 = vld [vmem:[#allocation19 + $0x160] sm:$0xff] }
 0x281   : > { %2205 = vmatpush1.bf16.msra.mxu0 %v2204_v61  ;;  %v1445_v61 = vld [vmem:[#allocation19 + $0x148] sm:$0xff]  ;;  %v1451_v1 = vld [vmem:[#allocation19 + $0x178] sm:$0xff] }
 0x282   : > { %2239 = vmatprep.subr.bf16.mxu0 %v2238_v2  ;;  %v1444_v2 = vld [vmem:[#allocation19 + $0x140] sm:$0xff]  ;;  %v2290_v4 = vpack.c.bf16 %v1451_v1, %v1447_v63 }
 0x283   : > { %2221 = vmatpush1.bf16.msra.mxu1 %v2220_v10  ;;  %v2272_v10 = vpack.c.bf16 %v1410_v9, %v1406_v7  ;;  %v1450_v7 = vld [vmem:[#allocation19 + $0x170] sm:$0xff] }
 0x284   : > { %2223 = vmatprep.subr.bf16.mxu1 %v2222_v18  ;;  %1327 = vmatmul.mubr.f32.vlgmr.msra.gmra.mrb[4].mxu0 %v3416_v30  ;;  %v2274_v18 = vpack.c.bf16 %v1419_v15, %v1415_v13  ;;  %v2292_v9 = vpack.c.bf16 %v1450_v7, %v1446_v6  ;;  %v1452_v15 = vld [vmem:[#allocation19 + $0x180] sm:$0xff] }
 0x285   : > { %2241 = vmatpush1.bf16.msra.mxu0 %v2240_v8  ;;  %1532 = vmatprep.mubr.f32.mxu0 %v2973_v52  ;;  %v1453_v8 = vld [vmem:[#allocation19 + $0x188] sm:$0xff] }
 0x286   : > { %2243 = vmatprep.subr.bf16.mxu0 %v2242_v14  ;;  %v2294_v14 = vpack.c.bf16 %v1459_v12, %v1455_v11 }
 0x287   : > { %2225 = vmatpush1.bf16.msra.mxu1 %v2224_v27  ;;  %v1427_v27 = vld [vmem:[#allocation19 + $0xb8] sm:$0xff] }
 0x288   : > { %2227 = vmatprep.subr.bf16.mxu1 %v2226_v34  ;;  %v2278_v31 = vpack.c.bf16 %v1427_v27, %v1423_v24  ;;  %v1422_v34 = vld [vmem:[#allocation19 + $0x90] sm:$0xff]  ;;  %v1467_v24 = vld [vmem:[#allocation19 + $0x1f8] sm:$0xff] }
 0x289   : > { %2245 = vmatpush1.bf16.msra.mxu0 %v2244_v19  ;;  %v2280_v36 = vpack.c.bf16 %v1426_v35, %v1422_v34  ;;  %v1458_v19 = vld [vmem:[#allocation19 + $0x1b0] sm:$0xff]  ;;  %v2298_v27 = vpack.c.bf16 %v1467_v24, %v1463_v23 }
 0x28a   : > { %2247 = vmatprep.subr.bf16.mxu0 %v2246_v25  ;;  %v1460_v25 = vld [vmem:[#allocation19 + $0x1c0] sm:$0xff] }
 0x28b   : > { %2229 = vmatpush1.bf16.msra.mxu1 %v2228_v40  ;;  %v1428_v40 = vld [vmem:[#allocation19 + $0xc0] sm:$0xff] }
 0x28c   : > { %2231 = vmatprep.subr.bf16.mxu1 %v2230_v45  ;;  %v2252_v43 = vpack.c.bf16 %v1432_v41, %v1428_v40  ;;  %v1434_v45 = vld [vmem:[#allocation19 + $0xf0] sm:$0xff]  ;;  %v872_v41 = vlaneseq }
 0x28d   : > { %2249 = vmatpush1.bf16.msra.mxu0 %v2248_v32  ;;  %v2284_v46 = vpack.c.bf16 %v1434_v45, %v1430_v44  ;;  %v2268_v32 = vpack.c.bf16 %v1464_v28, %v1460_v25 }
 0x28f   : > { %2233 = vmatpush1.bf16.msra.mxu1 %v2232_v53  ;;  %v1436_v53 = vld [vmem:[#allocation19 + $0x100] sm:$0xff] }
 0x290   : > { %2235 = vmatprep.subr.bf16.mxu1 %v2234_v58  ;;  %v2256_v57 = vpack.c.bf16 %v1440_v55, %v1436_v53  ;;  %v1438_v58 = vld [vmem:[#allocation19 + $0x110] sm:$0xff] }
 0x291   : > { %v2288_v60 = vpack.c.bf16 %v1442_v59, %v1438_v58  ;;  %v955_v59 = vld [vmem:[#allocation3] sm:$0xff] }
 0x293   : > { %2237 = vmatpush1.bf16.msra.mxu1 %v2236_v62  ;;  %v1449_v62 = vld [vmem:[#allocation19 + $0x168] sm:$0xff] }
 0x294   : > { %2271 = vmatprep.subr.bf16.mxu1 %v2270_v5  ;;  %v2258_v0 = vpack.c.bf16 %v1449_v62, %v1445_v61  ;;  %v2260_v5 = vpack.c.bf16 %v1448_v3, %v1444_v2 }
 0x296   : > { %1398 = vmatmul.mubr.f32.vlgmr.msra.gmra.mrb[4].mxu1 %v3416_v30  ;;  %v2276_v30 = vpack.c.bf16 %v1418_v21, %v1414_v20  ;;  %v1461_v20 = vld [vmem:[#allocation19 + $0x1c8] sm:$0xff] }
 0x297   : > { %2273 = vmatpush1.bf16.msra.mxu1 %v2272_v10  ;;  %1603 = vmatprep.mubr.f32.mxu1 %v2973_v52  ;;  %v1429_v52 = vld [vmem:[#allocation19 + $0xc8] sm:$0xff] }
 0x298   : > { %2275 = vmatprep.subr.bf16.mxu1 %v2274_v18  ;;  %v2250_v39 = vpack.c.bf16 %v1433_v37, %v1429_v52  ;;  %v1457_v10 = vld [vmem:[#allocation19 + $0x1a8] sm:$0xff]  ;;  %v2264_v18 = vpack.c.bf16 %v1456_v16, %v1452_v15  ;;  %v1163_v52 = vld [vmem:[%s3380_s11 + $0x8] sm:$0xff]  ;;  %v1162_v37 = vld [vmem:[%s3380_s11] sm:$0xff] }
 0x299   : > { %v2262_v13 = vpack.c.bf16 %v1457_v10, %v1453_v8  ;;  %v1465_v21 = vld [vmem:[#allocation19 + $0x1e8] sm:$0xff]  ;;  %v1167_v38 = vadd.f32 %v1163_v52, %v3432_v33  ;;  %v1164_v33 = vld [vmem:[%s3380_s11 + $0x10] sm:$0xff]  ;;  %s3643_s11 = sld [smem:[#allocation43_spill]] }
 0x29a   : > { %2251 = vmatprep.subr.bf16.mxu0 %v2250_v39  ;;  %v2266_v22 = vpack.c.bf16 %v1465_v21, %v1461_v20  ;;  %v1166_v39 = vadd.f32 %v1162_v37, %v3430_v26  ;;  %v1197_v37 = vld [vmem:[#allocation3 + $0x8] sm:$0xff] }
 0x29b   : > { %2277 = vmatpush1.bf16.msra.mxu1 %v2276_v30  ;;  %2253 = vmatpush1.bf16.msra.mxu0 %v2252_v43  ;;  %v2296_v30 = vpack.c.bf16 %v1458_v19, %v1454_v17  ;;  %v1994_v54 = vmul.f32 -1.442695, %v1167_v38 }
 0x29c   : > { %2279 = vmatprep.subr.bf16.mxu1 %v2278_v31  ;;  %2255 = vmatprep.subr.bf16.mxu0 %v2254_v50  ;;  %v1466_v31 = vld [vmem:[#allocation19 + $0x1f0] sm:$0xff]  ;;  %v1993_v40 = vmul.f32 -1.442695, %v1166_v39 }
 0x29d   : > { %v2300_v34 = vpack.c.bf16 %v1466_v31, %v1462_v29  ;;  %2476 = vpow2.f32 %v1994_v54 }
 0x29e   : > { %2478 = vpow2.f32 %v1993_v40 }
 0x29f   : > { %2281 = vmatpush1.bf16.msra.mxu1 %v2280_v36  ;;  %2257 = vmatpush1.bf16.msra.mxu0 %v2256_v57  ;;  %v1610_v8 = vld [vmem:[%s3643_s11] sm:$0xf] }
 0x2a0   : > { %2283 = vmatprep.subr.bf16.mxu1 %v2282_v42  ;;  %2259 = vmatprep.subr.bf16.mxu0 %v2258_v0  ;;  %v3444_v42 = vshrl.u32 %v872_v41, 7 }
 0x2a2   : > { %v874_v45 = vsub.s32 0, %v3444_v42  ;;  %v1622_v19 = vsub.s32 2, %v3444_v42  ;;  %v1626_v21 = vsub.s32 3, %v3444_v42 }
 0x2a3   : > { %2285 = vmatpush1.bf16.msra.mxu1 %v2284_v46  ;;  %2261 = vmatpush1.bf16.msra.mxu0 %v2260_v5 }
 0x2a4   : > { %2287 = vmatprep.subr.bf16.mxu1 %v2286_v56  ;;  %2263 = vmatprep.subr.bf16.mxu0 %v2262_v13  ;;  %v875_v26 = vrot.slane %v870_v47, %v874_v45  ;;  %v1615_v10 = vrot.slane %v1610_v8, %v874_v45 }
 0x2a7   : > { %2289 = vmatpush1.bf16.msra.mxu1 %v2288_v60  ;;  %2265 = vmatpush1.bf16.msra.mxu0 %v2264_v18  ;;  %v2477_v43 = vpop.eup %2476 }
 0x2a8   : > { %2291 = vmatprep.subr.bf16.mxu1 %v2290_v4  ;;  %2267 = vmatprep.subr.bf16.mxu0 %v2266_v22  ;;  %v2479_v44 = vpop.eup %2478  ;;  %v1179_v46 = vadd.f32 1.0, %v2477_v43  ;;  %v1627_v22 = vrot.slane %v1610_v8, %v1626_v21 }
 0x2a9   : > { %v1173_v48 = vadd.f32 1.0, %v2479_v44 }
 0x2aa   : > { %2480 = vrcp.f32 %v1179_v46 }
 0x2ab   : > { %2293 = vmatpush1.bf16.msra.mxu1 %v2292_v9  ;;  %2269 = vmatpush1.bf16.msra.mxu0 %v2268_v32  ;;  %2482 = vrcp.f32 %v1173_v48  ;;  %v878_v9 = vsub.s32 1, %v3444_v42 }
 0x2ac   : > { %2295 = vmatprep.subr.bf16.mxu1 %v2294_v14 }
 0x2ad   : > { %v1619_v11 = vrot.slane %v1610_v8, %v878_v9  ;;  %v879_v28 = vrot.slane %v870_v47, %v878_v9 }
 0x2af   : > { %2297 = vmatpush1.bf16.msra.mxu1 %v2296_v30  ;;  %v1623_v30 = vrot.slane %v1610_v8, %v1622_v19 }
 0x2b0   : > { %2299 = vmatprep.subr.bf16.mxu1 %v2298_v27 }
 0x2b3   : > { %2301 = vmatpush1.bf16.msra.mxu1 %v2300_v34 }
 0x2b4   : > { %v2481_v58 = vpop.eup %2480 }
 0x2b5   : > { %v2483_v60 = vpop.eup %2482  ;;  %v1189_v61 = vmul.f32 %v2481_v58, %v955_v59 }
 0x329   : > { %v948_v35 = vpop.f32.mrb[0].mxu1 }
 0x32a   : > { %v3438_v36 = vpop.f32.mrb[1].mxu1  ;;  %v949_v57 = vadd.f32 %v948_v35, %v875_v26  ;;  %v1676_v26 = vld [vmem:[#allocation4] sm:$0xff] (!%p1999_p13) }
 0x32b   : > { %v951_v34 = vadd.f32 %v3438_v36, %v879_v28  ;;  %1677 = vst [vmem:[#allocation24] sm:$0xff] (!%p1999_p13), %v1676_v26 }
 0x349   : > { %v1157_v50 = vpop.f32.mrb[2].mxu1 }
 0x34a   : > { %v1168_v51 = vadd.f32 %v1164_v33, %v1157_v50  ;;  %v1159_v53 = vpop.f32.mrb[3].mxu1 }
 0x34b   : > { %v1169_v55 = vadd.f32 %v1165_v49, %v1159_v53 }
 0x34c   : > { %v1995_v56 = vmul.f32 -1.442695, %v1168_v51 }
 0x34d   : > { %2484 = vtanh.f32 %v1169_v55 }
 0x34e   : > { %2486 = vpow2.f32 %v1995_v56 }
 0x34f   : > { %2488 = vtanh.f32 %v949_v57 }
 0x357   : > { %v2485_v62 = vpop.eup %2484 }
 0x358   : > { %v2487_v63 = vpop.eup %2486  ;;  %v1190_v0 = vmul.f32 %v2485_v62, %v2483_v60 }
 0x359   : > { %v1185_v1 = vadd.f32 1.0, %v2487_v63  ;;  %v2489_v3 = vpop.eup %2488 }
 0x35a   : > { %v1191_v2 = vadd.f32 %v1190_v0, %v1189_v61 }
 0x35b   : > { %2490 = vrcp.f32 %v1185_v1 }
 0x35c   : > { %v1192_v4 = vadd.f32 %v2489_v3, %v1191_v2 }
 0x35e   : > { %2492 = vtanh.f32 %v1192_v4  ;;  %1195 = vst [vmem:[#allocation3] sm:$0xff] %v1192_v4 }
 0x365   : > { %v2491_v5 = vpop.eup %2490  ;;  %v1672_v33 = vld [vmem:[#allocation3] sm:$0xff] (!%p1999_p13) }
 0x366   : > { %1674 = vst [vmem:[#allocation23] sm:$0xff] (!%p1999_p13), %v1672_v33 }
 0x368   : > { %v2493_v6 = vpop.eup %2492 }
 0x369   : > { %v1194_v7 = vmul.f32 %v2493_v6, %v2491_v5 }
 0x36b   : > { %1196 = vst [vmem:[#allocation2] sm:$0xff] %v1194_v7  ;;  %1533 = vmatmul.mubr.f32.vlgmr.msra.gmra.mrb[4].mxu0 %v1194_v7  ;;  %1604 = vmatmul.mubr.f32.vlgmr.msra.gmra.mrb[4].mxu1 %v1194_v7 }
 0x372   : > { %v1668_v47 = vld [vmem:[#allocation2] sm:$0xff] (!%p1999_p13) }
 0x373   : > { %1670 = vst [vmem:[#allocation21] sm:$0xff] (!%p1999_p13), %v1668_v47 }
 0x43e   : > { %v1534_v12 = vpop.f32.mrb[4].mxu0  ;;  %v1605_v13 = vpop.f32.mrb[4].mxu1 }
 0x43f   : > { %v1632_v14 = vadd.f32 %v1615_v10, %v1534_v12  ;;  %v1536_v15 = vpop.f32.mrb[5].mxu0  ;;  %v1607_v16 = vpop.f32.mrb[5].mxu1  ;;  %v1634_v23 = vadd.f32 %v1623_v30, %v1605_v13 }
 0x440   : > { %v1633_v17 = vadd.f32 %v1619_v11, %v1536_v15  ;;  %v1635_v24 = vadd.f32 %v1627_v22, %v1607_v16 }
 0x441   : > { %v1996_v18 = vmul.f32 -1.442695, %v1632_v14  ;;  %v1998_v27 = vmul.f32 -1.442695, %v1634_v23 }
 0x442   : > { %v1997_v20 = vmul.f32 -1.442695, %v1633_v17 }
 0x443   : > { %2494 = vpow2.f32 %v1996_v18 }
 0x444   : > { %2496 = vpow2.f32 %v1997_v20 }
 0x445   : > { %2498 = vtanh.f32 %v1635_v24 }
 0x44d   : > { %v2495_v25 = vpop.eup %2494 }
 0x44e   : > { %v1639_v29 = vadd.f32 1.0, %v2495_v25  ;;  %v2497_v31 = vpop.eup %2496 }
 0x44f   : > { %v1645_v32 = vadd.f32 1.0, %v2497_v31  ;;  %v2499_v35 = vpop.eup %2498 }
 0x450   : > { %2500 = vrcp.f32 %v1639_v29 }
 0x451   : > { %2502 = vpow2.f32 %v1998_v27 }
 0x452   : > { %2504 = vrcp.f32 %v1645_v32 }
 0x453   : > { %2506 = vtanh.f32 %v951_v34 }
 0x45a   : > { %v2501_v52 = vpop.eup %2500 }
 0x45b   : > { %v2503_v38 = vpop.eup %2502  ;;  %v1656_v39 = vmul.f32 %v2501_v52, %v2499_v35 }
 0x45c   : > { %v2505_v54 = vpop.eup %2504  ;;  %v1651_v41 = vadd.f32 1.0, %v2503_v38 }
 0x45d   : > { %v1655_v40 = vmul.f32 %v2505_v54, %v1197_v37  ;;  %v2507_v43 = vpop.eup %2506 }
 0x45e   : > { %2508 = vrcp.f32 %v1651_v41 }
 0x45f   : > { %v1657_v42 = vadd.f32 %v1656_v39, %v1655_v40 }
 0x461   : > { %v1658_v44 = vadd.f32 %v2507_v43, %v1657_v42 }
 0x463   : > { %2510 = vtanh.f32 %v1658_v44  ;;  %1661 = vst [vmem:[#allocation3 + $0x8] sm:$0xff] %v1658_v44 }
 0x468   : > { %v2509_v45 = vpop.eup %2508 }
 0x46a   : > { %1667 = sbr.rel (%p1999_p13) target bundleno = 1145 (0x479), region = 112  ;;  %v1673_v49 = vld [vmem:[#allocation3 + $0x8] sm:$0xff] (!%p1999_p13) }
 0x46b   : > { %1675 = vst [vmem:[#allocation23 + $0x8] sm:$0xff] (!%p1999_p13), %v1673_v49 }
 0x46d   : > { %v2511_v46 = vpop.eup %2510 }
 0x46e   : > { %v1660_v36 = vmul.f32 %v2511_v46, %v2509_v45 }
 0x470   : > { %1662 = vst [vmem:[#allocation2 + $0x8] sm:$0xff] %v1660_v36  ;;  %1663 = vst [vmem:[%s3410_s7] sm:$0xff] %v1660_v36 }
 0x477   : > { %v1669_v48 = vld [vmem:[#allocation2 + $0x8] sm:$0xff] }
 0x478   : > { %1671 = vst [vmem:[#allocation21 + $0x8] sm:$0xff] %v1669_v48 }
 0x479 PF: > { %s2974_s14 = smov [#allocation21]   ;;  %s3645_s25 = sld [smem:[#allocation35_spill]] }
 0x47a   : > { %s1707_s12 = sshll.u32 %s2974_s14, 4  ;;  %p3646_p12 = scmp.eq.s32.totalorder %s3089_s24, 7  ;;  %s1708_s12 = int_to_ptr.vmem [resolvable:$true] %s1707_s12 }
 0x47b   : > { %s2768_s4 = scalar_lea.vmem %s1708_s12, 256  ;;  %p2775_p4 = scmp.lt.s32.totalorder %s1708_s12, %s1708_s12 }
 0x47c   : > { %p2769_p9 = scmp.ne.s32.totalorder %s1708_s12, %s2768_s4  ;;  %p2776_p6 = scmp.lt.s32.totalorder %s2768_s4, %s2768_s4 }
 0x47e   : > { %p2770_p2 = pnand %p2769_p9, %p3646_p12  ;;  %p2777_p0 = por %p2776_p6, %p2775_p4 }
 0x47f   : > { %s2001_s21 = sshll.u32 %s3645_s25, 7 }
 0x480   : > { %p2771_p5 = pneg %p2770_p2 }
 0x482   : > { %p2778_p7 = pnand %p2777_p0, %p2771_p5 }
 0x484   : > { %2781 = shalt.err (!%p2778_p7)
}
 0x485   : > { %s3647_s16 = sld [smem:[#allocation45_spill]]  ;;  %p3648_p1 = pmov %p3646_p12 }
 0x48b   : > { %s2782_s30 = scalar_lea.hbm %s3647_s16, 256 }
 0x48c   : > { %p2783_p8 = scmp.ne.s32.totalorder %s3647_s16, %s2782_s30  ;;  %p2788_p10 = scmp.lt.u32.totalorder %s2782_s30, %s3647_s16 }
 0x48e   : > { %p2784_p3 = pnand %p2783_p8, %p3648_p1 }
 0x490   : > { %p2785_p11 = pneg %p2784_p3 }
 0x492   : > { %p2790_p13 = pnand %p2788_p10, %p2785_p11 }
 0x494   : > { %2793 = shalt.err (!%p2790_p13)
}
 0x495   : > { %p3649_p9 = pmov %p3648_p1  ;;  %s3650_s26 = sld [smem:[#allocation44_spill]] }
 0x496   : > { %s1693_s5 = sshll.u32 %s3410_s7, 4  ;;  %s1679_s15 = scalar_lea.sflag [#allocation7], %s3376_s13  ;;  %s1694_s5 = int_to_ptr.vmem [resolvable:$true] %s1693_s5 }
 0x497   : > { %2340 = dma.vmem_to_hbm [thread:$0]  (%p3649_p9), %s1708_s12, 256, %s3647_s16, [#allocation22]  }
 0x498   : > { %s2794_s30 = scalar_lea.vmem %s1694_s5, 128  ;;  %p3651_p2 = scmp.ne.s32.totalorder %s3624_s29, 0 }
 0x499   : > { %p2795_p12 = scmp.ne.s32.totalorder %s1694_s5, %s2794_s30  ;;  %s2975_s27 = smov [#allocation20]  }
 0x49a   : > { %s2798_s11 = sshll.u32 %s2975_s27, 4  ;;  %s2799_s11 = int_to_ptr.vmem [resolvable:$false] %s2798_s11 }
 0x49b   : > { %s3483_s2 = scalar_lea.hbm %s3650_s26, %s2001_s21  ;;  %p2796_p5 = pnand %p2795_p12, %p3651_p2 }
 0x49c   : > { %s2800_s0 = scalar_lea.vmem %s2799_s11, 256  ;;  %p2801_p6 = scmp.lt.s32.totalorder %s1694_s5, %s2799_s11 }
 0x49d   : > { %p2797_p4 = pneg %p2796_p5  ;;  %p2802_p0 = scmp.lt.s32.totalorder %s2800_s0, %s2794_s30 }
 0x49f   : > { %p2803_p7 = por %p2802_p0, %p2801_p6 }
 0x4a1   : > { %p2804_p8 = pnand %p2803_p7, %p2797_p4 }
 0x4a3   : > { %2807 = shalt.err (!%p2804_p8)
}
 0x4a4   : > { %s2808_s13 = scalar_lea.hbm %s3483_s2, 128  ;;  %s2812_s21 = scalar_lea.hbm %s3650_s26, 1024 }
 0x4a5   : > { %p2809_p1 = scmp.ne.s32.totalorder %s3483_s2, %s2808_s13  ;;  %p2813_p10 = scmp.lt.u32.totalorder %s3483_s2, %s3650_s26 }
 0x4a6   : > { %p2814_p13 = scmp.lt.u32.totalorder %s2812_s21, %s2808_s13  ;;  %p2816_p12 = scmp.lt.u32.totalorder %s2808_s13, %s3483_s2 }
 0x4a7   : > { %p2810_p3 = pnand %p2809_p1, %p3651_p2 }
 0x4a8   : > { %p2815_p9 = por %p2814_p13, %p2813_p10 }
 0x4a9   : > { %p2811_p11 = pneg %p2810_p3 }
 0x4aa   : > { %p2817_p5 = por %p2816_p12, %p2815_p9 }
 0x4ac   : > { %p2818_p4 = pnand %p2817_p5, %p2811_p11 }
 0x4ae   : > { %2821 = shalt.err (!%p2818_p4)
}
 0x4af   : > { %2338 = dma.vmem_to_hbm [thread:$0]  (%p3651_p2), %s1694_s5, 128, %s3483_s2, %s1679_s15  }
 0x4b0   : > { %s2976_s4 = smov [#allocation23]   ;;  %s2977_s27 = smov [#allocation24]  }
 0x4b1   : > { %s1721_s30 = sshll.u32 %s2976_s4, 4  ;;  %s1734_s11 = sshll.u32 %s2977_s27, 4  ;;  %s1722_s30 = int_to_ptr.vmem [resolvable:$true] %s1721_s30  ;;  %s1735_s11 = int_to_ptr.vmem [resolvable:$true] %s1734_s11 }
 0x4b2   : > { %s2822_s0 = scalar_lea.vmem %s1722_s30, 256  ;;  %p3652_p0 = scmp.eq.s32.totalorder %s3089_s24, 7 }
 0x4b3   : > { %p2823_p6 = scmp.ne.s32.totalorder %s1722_s30, %s2822_s0  ;;  %p2829_p1 = scmp.lt.s32.totalorder %s1722_s30, %s1722_s30 }
 0x4b4   : > { %p2830_p3 = scmp.lt.s32.totalorder %s2822_s0, %s2822_s0 }
 0x4b5   : > { %p2824_p7 = pnand %p2823_p6, %p3652_p0 }
 0x4b6   : > { %p2831_p10 = por %p2830_p3, %p2829_p1 }
 0x4b7   : > { %p2825_p8 = pneg %p2824_p7 }
 0x4b9   : > { %p2832_p11 = pnand %p2831_p10, %p2825_p8 }
 0x4bb   : > { %2835 = shalt.err (!%p2832_p11)
}
 0x4bc   : > { %s3653_s7 = sld [smem:[#allocation46_spill]]  ;;  %p3654_p13 = pmov %p3652_p0 }
 0x4c2   : > { %s2836_s2 = scalar_lea.hbm %s3653_s7, 256 }
 0x4c3   : > { %p2837_p2 = scmp.ne.s32.totalorder %s3653_s7, %s2836_s2  ;;  %p2842_p5 = scmp.lt.u32.totalorder %s2836_s2, %s3653_s7 }
 0x4c5   : > { %p2838_p9 = pnand %p2837_p2, %p3654_p13 }
 0x4c7   : > { %p2839_p12 = pneg %p2838_p9 }
 0x4c9   : > { %p2844_p4 = pnand %p2842_p5, %p2839_p12 }
 0x4cb   : > { %2847 = shalt.err (!%p2844_p4)
}
 0x4cc   : > { %p3655_p6 = pmov %p3652_p0  ;;  %s2848_s4 = scalar_lea.vmem %s1735_s11, 128 }
 0x4cd   : > { %p2849_p0 = scmp.ne.s32.totalorder %s1735_s11, %s2848_s4  ;;  %p2855_p3 = scmp.lt.s32.totalorder %s1735_s11, %s1735_s11 }
 0x4ce   : > { %2342 = dma.vmem_to_hbm [thread:$0]  (%p3655_p6), %s1722_s30, 256, %s3653_s7, [#allocation22]  }
 0x4cf   : > { %p3656_p7 = pmov %p3655_p6  ;;  %p2856_p10 = scmp.lt.s32.totalorder %s2848_s4, %s2848_s4 }
 0x4d1   : > { %p2850_p8 = pnand %p2849_p0, %p3656_p7  ;;  %p2857_p11 = por %p2856_p10, %p2855_p3 }
 0x4d3   : > { %p2851_p1 = pneg %p2850_p8 }
 0x4d5   : > { %p2858_p2 = pnand %p2857_p11, %p2851_p1 }
 0x4d7   : > { %2861 = shalt.err (!%p2858_p2)
}
 0x4d8   : > { %s3657_s13 = sld [smem:[#allocation47_spill]]  ;;  %p3658_p9 = pmov %p3655_p6 }
 0x4de   : > { %s2862_s29 = scalar_lea.hbm %s3657_s13, 128 }
 0x4df   : > { %p2863_p13 = scmp.ne.s32.totalorder %s3657_s13, %s2862_s29  ;;  %p2868_p4 = scmp.lt.u32.totalorder %s2862_s29, %s3657_s13 }
 0x4e1   : > { %p2864_p12 = pnand %p2863_p13, %p3658_p9 }
 0x4e3   : > { %p2865_p5 = pneg %p2864_p12 }
 0x4e5   : > { %p2870_p6 = pnand %p2868_p4, %p2865_p5 }
 0x4e7   : > { %2873 = shalt.err (!%p2870_p6)
}
 0x4e8   : > { %p3659_p0 = pmov %p3656_p7 }
 0x4ea   : > { %2344 = dma.vmem_to_hbm [thread:$0]  (%p3659_p0), %s1735_s11, 128, %s3657_s13, [#allocation25]  }
 0x4eb   : > { %p3660_p7 = pmov %p3659_p0 }
 0x4ec   : > { %p3661_p8 = pmov %p3659_p0 }
 0x4ed   : > { %2923 = dma.done.wait (%p3660_p7), [#allocation22], 512  }
 0x4ee   : > { %2925 = vsyncadd (%p3661_p8), [#allocation22], 4294966784  ;;  %p3662_p1 = pmov %p3659_p0 }
 0x4ef   : > { %p3663_p3 = pmov %p3659_p0 }
 0x4f0   : > { %2927 = dma.done.wait (%p3662_p1), [#allocation25], 128  }
 0x4f1   : > { %2929 = vsyncadd (%p3663_p3), [#allocation25], 4294967168 }
 0x4f2 PF: > { %p2406_p10 = scmp.ge.s32.totalorder %s2956_s23, 2  ;;  %s1758_s14 = sand.u32 1, %s2936_s18  }
 0x4f3   : > { %p3664_p11 = scmp.ne.s32.totalorder %s3625_s17, 0  ;;  %s1759_s11 = scalar_lea.sflag [#allocation7], %s1758_s14 }
 0x4f5   : > { %p2382_p2 = pnand %p2406_p10, %p3664_p11 }
 0x4f7   : > { %2931 = dma.done.wait (!%p2382_p2), %s1759_s11, 128  }
 0x4f8   : > { %2933 = vsyncadd (!%p2382_p2), %s1759_s11, 4294967168  ;;  %s40_s23 = sadd.s32 1, %s2956_s23   ;;  %s3665_s18 = smov %s2940_s19 }
 0x4f9   : > { %p37_p13 = scmp.ge.s32.totalorder %s40_s23, 10   ;;  %s3666_s19 = smov %s2944_s20 }
 0x4fa   : > { %s3667_s20 = smov %s3292_s3  ;;  %s3668_s21 = smov %s2952_s22 }
 0x4fb   : > { %s3669_s22 = smov %s3671_s28  ;;  %39 = sbr.rel (!%p37_p13) target bundleno = 25 (0x19), region = 194 }
 0x502   :  { %1764 = vsyncpa [#allocation6], 1 }
 0x503   :  { %1766 = vsyncpa [#allocation6 + $0x1], 1 }
 0x504   :  { %1767 = vsyncpa [#allocation9], 1 }
 0x505   :  { %1769 = vsyncpa [#allocation9 + $0x1], 1 }
 0x506   :  { %1770 = vsyncpa [#allocation12], 1 }
 0x507   :  { %1771 = vsyncpa [#allocation15], 1 }
 0x508   :  { %1772 = vsyncpa [#allocation18], 1 }
 0x509   :  { %1773 = vsyncpa [#allocation7], 1 }
 0x50a   :  { %1775 = vsyncpa [#allocation7 + $0x1], 1 }
 0x50b   :  { %1776 = vsyncpa [#allocation22], 1 }
 0x50c   :  { %1777 = vsyncpa [#allocation25], 1 }

</bundles_post_ra>
